<compile_context>
chip_gen: v7x
topology: tpu7x:2x2x1
jax: 0.10.0
libtpu: 0.0.40
codegen_flags: <defaults>
</compile_context>

<pallas_src>
import functools

import jax
import jax.numpy as jnp
from jax.experimental import pallas as pl
from jax.experimental.pallas import tpu as pltpu


def _shifted_tap(x, dy, dx, W, col):
    """Return y with y[:, h*W + w] = x[:, (h+dy)*W + (w+dx)], zero outside HxW.

    x   : (C, H*W) f32, flattened row-major spatial.
    col : (1, H*W) int32, lane-index % W (column-within-row).
    The zero fill of the end-of-array slices covers the vertical (h) padding;
    the `col` mask covers the horizontal (w) padding / row wrap-around.
    """
    C, HW = x.shape
    s = dy * W + dx
    if s > 0:
        y = jnp.concatenate([x[:, s:], jnp.zeros((C, s), x.dtype)], axis=1)
    elif s < 0:
        y = jnp.concatenate([jnp.zeros((C, -s), x.dtype), x[:, :s]], axis=1)
    else:
        y = x
    if dx == 1:
        y = jnp.where(col < (W - 1), y, 0.0)
    elif dx == -1:
        y = jnp.where(col >= 1, y, 0.0)
    return y


def _conv3x3(x, w_mat, W, col):
    """3x3 same-padding conv on a lane-dense (C_in, H*W) image.

    w_mat : (C_out, 9*C_in) f32, column index = (ky*3 + kx)*C_in + ci.
    Returns (C_out, H*W) f32 (bias NOT included).
    """
    C_in, HW = x.shape
    C_out = w_mat.shape[0]
    use_mxu = C_in >= 16          # tiny C: MXU push/pop is pure overhead -> VPU FMAs
    acc = jnp.zeros((C_out, HW), jnp.float32)
    t = 0
    for dy in (-1, 0, 1):
        for dx in (-1, 0, 1):
            tap = _shifted_tap(x, dy, dx, W, col)          # (C_in, HW)
            if use_mxu:
                acc = acc + jax.lax.dot_general(
                    w_mat[:, t * C_in:(t + 1) * C_in], tap,
                    dimension_numbers=(((1,), (0,)), ((), ())),
                    preferred_element_type=jnp.float32)
            else:
                for ci in range(C_in):
                    j = t * C_in + ci
                    # (C_out,1) * (1,HW) rank-1 broadcast FMA on the VPU.
                    acc = acc + w_mat[:, j:j + 1] * tap[ci:ci + 1, :]
            t += 1
    return acc


def _residual_block_kernel(x_ref, w0_ref, b0_ref, w1_ref, b1_ref, out_ref,
                           *, images_per_step, C, H, W):
    """images_per_step images per grid step.

    x_ref  : (nb, C, H*W)   original input (NOT relu'd), lane-dense spatial
    w*_ref : (C, 9*C)       conv weights, (co, (ky*3+kx)*C + ci)
    b*_ref : (C, 1)         conv biases
    out_ref: (nb, C, H*W)
    """
    HW = H * W
    # column-within-row for every lane; used to mask the horizontal halo taps.
    col = jax.lax.broadcasted_iota(jnp.int32, (1, HW), 1) % W

    # Load weights / biases once (already f32; no per-tap casts).
    w0 = w0_ref[...]
    b0 = b0_ref[...]
    w1 = w1_ref[...]
    b1 = b1_ref[...]

    for i in range(images_per_step):
        x = x_ref[i].astype(jnp.float32)                     # (C, HW), pre-relu input
        h = _conv3x3(jnp.maximum(x, 0.0), w0, W, col)        # conv0(relu(x))
        h = jnp.maximum(h + b0, 0.0)                         # relu(conv0 + b0)
        h = _conv3x3(h, w1, W, col) + b1                     # conv1(...) + b1
        out_ref[i] = (h + x).astype(out_ref.dtype)           # residual with pre-relu x


def _pick_images_per_step(N, C, HW, itemsize):
    """Largest per-step batch that keeps >=2 parallel grid steps (v7x megacore)
    and keeps double-buffered in/out blocks far inside the scoped VMEM limit."""
    vmem_budget = 2 * 1024 * 1024
    best = 1
    for nb in range(1, N + 1):
        if N % nb != 0:
            continue
        if N > 1 and N // nb < 2:
            continue                                    # keep both TensorCores busy
        if 4 * nb * C * HW * itemsize > vmem_budget:    # 2x in + 2x out (double buffer)
            continue
        best = nb
    return best


def residual_block_nchw(x_nchw, w0_oihw, b0, w1_oihw, b1, images_per_step=None):
    """PyTorch-convention entry: x (N, C, H, W); weights (C, C, 3, 3); biases (C,)."""
    N, C, H, W = x_nchw.shape
    HW = H * W

    # Free reshape: NCHW -> (N, C, H*W); spatial goes to the lane axis.
    x_flat = x_nchw.reshape(N, C, HW)

    # (Cout, Cin, ky, kx) -> (Cout, ky, kx, Cin) -> (Cout, 9*Cin); cast once.
    w0m = jnp.transpose(w0_oihw, (0, 2, 3, 1)).reshape(C, 9 * C).astype(jnp.float32)
    w1m = jnp.transpose(w1_oihw, (0, 2, 3, 1)).reshape(C, 9 * C).astype(jnp.float32)
    b0c = b0.reshape(C, 1).astype(jnp.float32)
    b1c = b1.reshape(C, 1).astype(jnp.float32)

    nb = images_per_step or _pick_images_per_step(
        N, C, HW, jnp.dtype(x_nchw.dtype).itemsize)
    assert N % nb == 0

    kernel = functools.partial(
        _residual_block_kernel, images_per_step=nb, C=C, H=H, W=W)

    out_flat = pl.pallas_call(
        kernel,
        out_shape=jax.ShapeDtypeStruct((N, C, HW), x_nchw.dtype),
        grid_spec=pltpu.PrefetchScalarGridSpec(
            num_scalar_prefetch=0,
            grid=(N // nb,),
            in_specs=[
                pl.BlockSpec((nb, C, HW), lambda n: (n, 0, 0)),
                pl.BlockSpec((C, 9 * C), lambda n: (0, 0)),
                pl.BlockSpec((C, 1), lambda n: (0, 0)),
                pl.BlockSpec((C, 9 * C), lambda n: (0, 0)),
                pl.BlockSpec((C, 1), lambda n: (0, 0)),
            ],
            out_specs=pl.BlockSpec((nb, C, HW), lambda n: (n, 0, 0)),
        ),
        compiler_params=pltpu.CompilerParams(
            dimension_semantics=("parallel",),
            vmem_limit_bytes=32 * 1024 * 1024,
        ),
    )(x_flat, w0m, b0c, w1m, b1c)

    return out_flat.reshape(N, C, H, W)


def _reference_nchw(x, w0, b0, w1, b1):
    """Plain-JAX reference of the PyTorch forward (sanity check)."""
    dn = jax.lax.conv_dimension_numbers(x.shape, w0.shape, ("NCHW", "OIHW", "NCHW"))
    h = jax.nn.relu(x)
    h = jax.lax.conv_general_dilated(h, w0, (1, 1), ((1, 1), (1, 1)),
                                     dimension_numbers=dn) + b0[None, :, None, None]
    h = jax.nn.relu(h)
    h = jax.lax.conv_general_dilated(h, w1, (1, 1), ((1, 1), (1, 1)),
                                     dimension_numbers=dn) + b1[None, :, None, None]
    return h + x


if __name__ == "__main__":
    N, C, H, W = 2, 4, 16, 16

    key = jax.random.PRNGKey(0)
    kx, kw0, kb0, kw1, kb1 = jax.random.split(key, 5)

    x = jax.random.normal(kx, (N, C, H, W), dtype=jnp.float32)
    w0 = jax.random.normal(kw0, (C, C, 3, 3), dtype=jnp.float32) * 0.1
    b0 = jax.random.normal(kb0, (C,), dtype=jnp.float32) * 0.1
    w1 = jax.random.normal(kw1, (C, C, 3, 3), dtype=jnp.float32) * 0.1
    b1 = jax.random.normal(kb1, (C,), dtype=jnp.float32) * 0.1

    run = jax.jit(residual_block_nchw)
    out = jax.block_until_ready(run(x, w0, b0, w1, b1))

    ref = jax.block_until_ready(_reference_nchw(x, w0, b0, w1, b1))
    assert out.shape == (N, C, H, W)
    assert jnp.allclose(out, ref, atol=1e-4, rtol=1e-4), "mismatch vs reference"

    print("KERNEL_OK")
</pallas_src>

<mosaic_0001>
module attributes {stable_mosaic.version = 11 : i64} {
  func.func @_residual_block_kernel(%arg0: i32, %arg1: memref<1x4x256xf32, #tpu.memory_space<vmem>>, %arg2: memref<4x36xf32, #tpu.memory_space<vmem>>, %arg3: memref<4x1xf32, #tpu.memory_space<vmem>>, %arg4: memref<4x36xf32, #tpu.memory_space<vmem>>, %arg5: memref<4x1xf32, #tpu.memory_space<vmem>>, %arg6: memref<1x4x256xf32, #tpu.memory_space<vmem>>) attributes {dimension_semantics = [#tpu.dimension_semantics<parallel>], iteration_bounds = array<i64: 2>, scalar_prefetch = 0 : i64, scratch_operands = 0 : i64, tpu.core_type = #tpu.core_type<tc>, window_params = [{transform_indices = @transform_0, window_bounds = array<i64: 1, 4, 256>}, {pipeline_mode = #tpu.pipeline_mode<synchronous>, transform_indices = @transform_1, window_bounds = array<i64: 4, 36>}, {pipeline_mode = #tpu.pipeline_mode<synchronous>, transform_indices = @transform_2, window_bounds = array<i64: 4, 1>}, {pipeline_mode = #tpu.pipeline_mode<synchronous>, transform_indices = @transform_3, window_bounds = array<i64: 4, 36>}, {pipeline_mode = #tpu.pipeline_mode<synchronous>, transform_indices = @transform_4, window_bounds = array<i64: 4, 1>}, {transform_indices = @transform_5, window_bounds = array<i64: 1, 4, 256>}]} {
    %0 = tpu.iota {dimensions = array<i32: 1>} : vector<1x256xi32>
    %c16_i32 = arith.constant 16 : i32
    %c0_i32 = arith.constant 0 : i32
    %1 = arith.cmpi eq, %c16_i32, %c0_i32 : i32
    %c1_i32 = arith.constant 1 : i32
    %2 = arith.select %1, %c1_i32, %c16_i32 : i32
    %3 = vector.broadcast %2 : i32 to vector<1x256xi32>
    %4 = arith.remsi %0, %3 : vector<1x256xi32>
    %c0_i32_0 = arith.constant 0 : i32
    %5 = vector.broadcast %c0_i32_0 : i32 to vector<1x256xi32>
    %6 = arith.cmpi ne, %4, %5 : vector<1x256xi32>
    %c0_i32_1 = arith.constant 0 : i32
    %7 = vector.broadcast %c0_i32_1 : i32 to vector<1x256xi32>
    %8 = arith.cmpi slt, %4, %7 : vector<1x256xi32>
    %c0_i32_2 = arith.constant 0 : i32
    %9 = arith.cmpi slt, %2, %c0_i32_2 : i32
    %10 = vector.broadcast %9 : i1 to vector<1x256xi1>
    %11 = vector.broadcast %10 : vector<1x256xi1> to vector<1x256xi1>
    %12 = arith.xori %8, %11 : vector<1x256xi1>
    %13 = arith.andi %12, %6 : vector<1x256xi1>
    %14 = vector.broadcast %2 : i32 to vector<1x256xi32>
    %15 = arith.addi %4, %14 : vector<1x256xi32>
    %16 = arith.select %13, %15, %4 : vector<1x256xi1>, vector<1x256xi32>
    %c0 = arith.constant 0 : index
    %c0_3 = arith.constant 0 : index
    %17 = vector.load %arg2[%c0, %c0_3] : memref<4x36xf32, #tpu.memory_space<vmem>>, vector<4x36xf32>
    %c0_4 = arith.constant 0 : index
    %c0_5 = arith.constant 0 : index
    %18 = vector.load %arg3[%c0_4, %c0_5] : memref<4x1xf32, #tpu.memory_space<vmem>>, vector<4x1xf32>
    %c0_6 = arith.constant 0 : index
    %c0_7 = arith.constant 0 : index
    %19 = vector.load %arg4[%c0_6, %c0_7] : memref<4x36xf32, #tpu.memory_space<vmem>>, vector<4x36xf32>
    %c0_8 = arith.constant 0 : index
    %c0_9 = arith.constant 0 : index
    %20 = vector.load %arg5[%c0_8, %c0_9] : memref<4x1xf32, #tpu.memory_space<vmem>>, vector<4x1xf32>
    %c0_10 = arith.constant 0 : index
    %c0_11 = arith.constant 0 : index
    %c0_12 = arith.constant 0 : index
    %21 = vector.load %arg1[%c0_10, %c0_11, %c0_12] : memref<1x4x256xf32, #tpu.memory_space<vmem>>, vector<1x4x256xf32>
    %22 = vector.shape_cast %21 : vector<1x4x256xf32> to vector<4x256xf32>
    %cst = arith.constant 0.000000e+00 : f32
    %23 = vector.broadcast %cst : f32 to vector<4x256xf32>
    %24 = arith.maximumf %22, %23 : vector<4x256xf32>
    %cst_13 = arith.constant 0.000000e+00 : f32
    %25 = vector.broadcast %cst_13 : f32 to vector<4x256xf32>
    %cst_14 = arith.constant 0.000000e+00 : f32
    %26 = vector.broadcast %cst_14 : f32 to vector<4x17xf32>
    %27 = vector.extract_strided_slice %24 {offsets = [0, 0], sizes = [4, 239], strides = [1, 1]} : vector<4x256xf32> to vector<4x239xf32>
    %28 = tpu.concatenate %26, %27 in 1 : vector<4x17xf32>, vector<4x239xf32> -> vector<4x256xf32>
    %c1_i32_15 = arith.constant 1 : i32
    %29 = vector.broadcast %c1_i32_15 : i32 to vector<1x256xi32>
    %30 = arith.cmpi sge, %16, %29 : vector<1x256xi32>
    %cst_16 = arith.constant 0.000000e+00 : f32
    %31 = vector.shape_cast %30 : vector<1x256xi1> to vector<1x256xi1>
    %32 = vector.broadcast %31 : vector<1x256xi1> to vector<4x256xi1>
    %33 = vector.broadcast %cst_16 : f32 to vector<4x256xf32>
    %34 = arith.select %32, %28, %33 : vector<4x256xi1>, vector<4x256xf32>
    %35 = vector.extract_strided_slice %17 {offsets = [0, 0], sizes = [4, 1], strides = [1, 1]} : vector<4x36xf32> to vector<4x1xf32>
    %36 = vector.extract_strided_slice %34 {offsets = [0, 0], sizes = [1, 256], strides = [1, 1]} : vector<4x256xf32> to vector<1x256xf32>
    %37 = vector.broadcast %35 : vector<4x1xf32> to vector<4x256xf32>
    %38 = vector.broadcast %36 : vector<1x256xf32> to vector<4x256xf32>
    %39 = arith.mulf %37, %38 : vector<4x256xf32>
    %40 = arith.addf %25, %39 : vector<4x256xf32>
    %41 = vector.extract_strided_slice %17 {offsets = [0, 1], sizes = [4, 1], strides = [1, 1]} : vector<4x36xf32> to vector<4x1xf32>
    %42 = vector.extract_strided_slice %34 {offsets = [1, 0], sizes = [1, 256], strides = [1, 1]} : vector<4x256xf32> to vector<1x256xf32>
    %43 = vector.broadcast %41 : vector<4x1xf32> to vector<4x256xf32>
    %44 = vector.broadcast %42 : vector<1x256xf32> to vector<4x256xf32>
    %45 = arith.mulf %43, %44 : vector<4x256xf32>
    %46 = arith.addf %40, %45 : vector<4x256xf32>
    %47 = vector.extract_strided_slice %17 {offsets = [0, 2], sizes = [4, 1], strides = [1, 1]} : vector<4x36xf32> to vector<4x1xf32>
    %48 = vector.extract_strided_slice %34 {offsets = [2, 0], sizes = [1, 256], strides = [1, 1]} : vector<4x256xf32> to vector<1x256xf32>
    %49 = vector.broadcast %47 : vector<4x1xf32> to vector<4x256xf32>
    %50 = vector.broadcast %48 : vector<1x256xf32> to vector<4x256xf32>
    %51 = arith.mulf %49, %50 : vector<4x256xf32>
    %52 = arith.addf %46, %51 : vector<4x256xf32>
    %53 = vector.extract_strided_slice %17 {offsets = [0, 3], sizes = [4, 1], strides = [1, 1]} : vector<4x36xf32> to vector<4x1xf32>
    %54 = vector.extract_strided_slice %34 {offsets = [3, 0], sizes = [1, 256], strides = [1, 1]} : vector<4x256xf32> to vector<1x256xf32>
    %55 = vector.broadcast %53 : vector<4x1xf32> to vector<4x256xf32>
    %56 = vector.broadcast %54 : vector<1x256xf32> to vector<4x256xf32>
    %57 = arith.mulf %55, %56 : vector<4x256xf32>
    %58 = arith.addf %52, %57 : vector<4x256xf32>
    %cst_17 = arith.constant 0.000000e+00 : f32
    %59 = vector.broadcast %cst_17 : f32 to vector<4x16xf32>
    %60 = vector.extract_strided_slice %24 {offsets = [0, 0], sizes = [4, 240], strides = [1, 1]} : vector<4x256xf32> to vector<4x240xf32>
    %61 = tpu.concatenate %59, %60 in 1 : vector<4x16xf32>, vector<4x240xf32> -> vector<4x256xf32>
    %62 = vector.extract_strided_slice %17 {offsets = [0, 4], sizes = [4, 1], strides = [1, 1]} : vector<4x36xf32> to vector<4x1xf32>
    %63 = vector.extract_strided_slice %61 {offsets = [0, 0], sizes = [1, 256], strides = [1, 1]} : vector<4x256xf32> to vector<1x256xf32>
    %64 = vector.broadcast %62 : vector<4x1xf32> to vector<4x256xf32>
    %65 = vector.broadcast %63 : vector<1x256xf32> to vector<4x256xf32>
    %66 = arith.mulf %64, %65 : vector<4x256xf32>
    %67 = arith.addf %58, %66 : vector<4x256xf32>
    %68 = vector.extract_strided_slice %17 {offsets = [0, 5], sizes = [4, 1], strides = [1, 1]} : vector<4x36xf32> to vector<4x1xf32>
    %69 = vector.extract_strided_slice %61 {offsets = [1, 0], sizes = [1, 256], strides = [1, 1]} : vector<4x256xf32> to vector<1x256xf32>
    %70 = vector.broadcast %68 : vector<4x1xf32> to vector<4x256xf32>
    %71 = vector.broadcast %69 : vector<1x256xf32> to vector<4x256xf32>
    %72 = arith.mulf %70, %71 : vector<4x256xf32>
    %73 = arith.addf %67, %72 : vector<4x256xf32>
    %74 = vector.extract_strided_slice %17 {offsets = [0, 6], sizes = [4, 1], strides = [1, 1]} : vector<4x36xf32> to vector<4x1xf32>
    %75 = vector.extract_strided_slice %61 {offsets = [2, 0], sizes = [1, 256], strides = [1, 1]} : vector<4x256xf32> to vector<1x256xf32>
    %76 = vector.broadcast %74 : vector<4x1xf32> to vector<4x256xf32>
    %77 = vector.broadcast %75 : vector<1x256xf32> to vector<4x256xf32>
    %78 = arith.mulf %76, %77 : vector<4x256xf32>
    %79 = arith.addf %73, %78 : vector<4x256xf32>
    %80 = vector.extract_strided_slice %17 {offsets = [0, 7], sizes = [4, 1], strides = [1, 1]} : vector<4x36xf32> to vector<4x1xf32>
    %81 = vector.extract_strided_slice %61 {offsets = [3, 0], sizes = [1, 256], strides = [1, 1]} : vector<4x256xf32> to vector<1x256xf32>
    %82 = vector.broadcast %80 : vector<4x1xf32> to vector<4x256xf32>
    %83 = vector.broadcast %81 : vector<1x256xf32> to vector<4x256xf32>
    %84 = arith.mulf %82, %83 : vector<4x256xf32>
    %85 = arith.addf %79, %84 : vector<4x256xf32>
    %cst_18 = arith.constant 0.000000e+00 : f32
    %86 = vector.broadcast %cst_18 : f32 to vector<4x15xf32>
    %87 = vector.extract_strided_slice %24 {offsets = [0, 0], sizes = [4, 241], strides = [1, 1]} : vector<4x256xf32> to vector<4x241xf32>
    %88 = tpu.concatenate %86, %87 in 1 : vector<4x15xf32>, vector<4x241xf32> -> vector<4x256xf32>
    %c15_i32 = arith.constant 15 : i32
    %89 = vector.broadcast %c15_i32 : i32 to vector<1x256xi32>
    %90 = arith.cmpi slt, %16, %89 : vector<1x256xi32>
    %cst_19 = arith.constant 0.000000e+00 : f32
    %91 = vector.shape_cast %90 : vector<1x256xi1> to vector<1x256xi1>
    %92 = vector.broadcast %91 : vector<1x256xi1> to vector<4x256xi1>
    %93 = vector.broadcast %cst_19 : f32 to vector<4x256xf32>
    %94 = arith.select %92, %88, %93 : vector<4x256xi1>, vector<4x256xf32>
    %95 = vector.extract_strided_slice %17 {offsets = [0, 8], sizes = [4, 1], strides = [1, 1]} : vector<4x36xf32> to vector<4x1xf32>
    %96 = vector.extract_strided_slice %94 {offsets = [0, 0], sizes = [1, 256], strides = [1, 1]} : vector<4x256xf32> to vector<1x256xf32>
    %97 = vector.broadcast %95 : vector<4x1xf32> to vector<4x256xf32>
    %98 = vector.broadcast %96 : vector<1x256xf32> to vector<4x256xf32>
    %99 = arith.mulf %97, %98 : vector<4x256xf32>
    %100 = arith.addf %85, %99 : vector<4x256xf32>
    %101 = vector.extract_strided_slice %17 {offsets = [0, 9], sizes = [4, 1], strides = [1, 1]} : vector<4x36xf32> to vector<4x1xf32>
    %102 = vector.extract_strided_slice %94 {offsets = [1, 0], sizes = [1, 256], strides = [1, 1]} : vector<4x256xf32> to vector<1x256xf32>
    %103 = vector.broadcast %101 : vector<4x1xf32> to vector<4x256xf32>
    %104 = vector.broadcast %102 : vector<1x256xf32> to vector<4x256xf32>
    %105 = arith.mulf %103, %104 : vector<4x256xf32>
    %106 = arith.addf %100, %105 : vector<4x256xf32>
    %107 = vector.extract_strided_slice %17 {offsets = [0, 10], sizes = [4, 1], strides = [1, 1]} : vector<4x36xf32> to vector<4x1xf32>
    %108 = vector.extract_strided_slice %94 {offsets = [2, 0], sizes = [1, 256], strides = [1, 1]} : vector<4x256xf32> to vector<1x256xf32>
    %109 = vector.broadcast %107 : vector<4x1xf32> to vector<4x256xf32>
    %110 = vector.broadcast %108 : vector<1x256xf32> to vector<4x256xf32>
    %111 = arith.mulf %109, %110 : vector<4x256xf32>
    %112 = arith.addf %106, %111 : vector<4x256xf32>
    %113 = vector.extract_strided_slice %17 {offsets = [0, 11], sizes = [4, 1], strides = [1, 1]} : vector<4x36xf32> to vector<4x1xf32>
    %114 = vector.extract_strided_slice %94 {offsets = [3, 0], sizes = [1, 256], strides = [1, 1]} : vector<4x256xf32> to vector<1x256xf32>
    %115 = vector.broadcast %113 : vector<4x1xf32> to vector<4x256xf32>
    %116 = vector.broadcast %114 : vector<1x256xf32> to vector<4x256xf32>
    %117 = arith.mulf %115, %116 : vector<4x256xf32>
    %118 = arith.addf %112, %117 : vector<4x256xf32>
    %cst_20 = arith.constant 0.000000e+00 : f32
    %119 = vector.broadcast %cst_20 : f32 to vector<4x1xf32>
    %120 = vector.extract_strided_slice %24 {offsets = [0, 0], sizes = [4, 255], strides = [1, 1]} : vector<4x256xf32> to vector<4x255xf32>
    %121 = tpu.concatenate %119, %120 in 1 : vector<4x1xf32>, vector<4x255xf32> -> vector<4x256xf32>
    %c1_i32_21 = arith.constant 1 : i32
    %122 = vector.broadcast %c1_i32_21 : i32 to vector<1x256xi32>
    %123 = arith.cmpi sge, %16, %122 : vector<1x256xi32>
    %cst_22 = arith.constant 0.000000e+00 : f32
    %124 = vector.shape_cast %123 : vector<1x256xi1> to vector<1x256xi1>
    %125 = vector.broadcast %124 : vector<1x256xi1> to vector<4x256xi1>
    %126 = vector.broadcast %cst_22 : f32 to vector<4x256xf32>
    %127 = arith.select %125, %121, %126 : vector<4x256xi1>, vector<4x256xf32>
    %128 = vector.extract_strided_slice %17 {offsets = [0, 12], sizes = [4, 1], strides = [1, 1]} : vector<4x36xf32> to vector<4x1xf32>
    %129 = vector.extract_strided_slice %127 {offsets = [0, 0], sizes = [1, 256], strides = [1, 1]} : vector<4x256xf32> to vector<1x256xf32>
    %130 = vector.broadcast %128 : vector<4x1xf32> to vector<4x256xf32>
    %131 = vector.broadcast %129 : vector<1x256xf32> to vector<4x256xf32>
    %132 = arith.mulf %130, %131 : vector<4x256xf32>
    %133 = arith.addf %118, %132 : vector<4x256xf32>
    %134 = vector.extract_strided_slice %17 {offsets = [0, 13], sizes = [4, 1], strides = [1, 1]} : vector<4x36xf32> to vector<4x1xf32>
    %135 = vector.extract_strided_slice %127 {offsets = [1, 0], sizes = [1, 256], strides = [1, 1]} : vector<4x256xf32> to vector<1x256xf32>
    %136 = vector.broadcast %134 : vector<4x1xf32> to vector<4x256xf32>
    %137 = vector.broadcast %135 : vector<1x256xf32> to vector<4x256xf32>
    %138 = arith.mulf %136, %137 : vector<4x256xf32>
    %139 = arith.addf %133, %138 : vector<4x256xf32>
    %140 = vector.extract_strided_slice %17 {offsets = [0, 14], sizes = [4, 1], strides = [1, 1]} : vector<4x36xf32> to vector<4x1xf32>
    %141 = vector.extract_strided_slice %127 {offsets = [2, 0], sizes = [1, 256], strides = [1, 1]} : vector<4x256xf32> to vector<1x256xf32>
    %142 = vector.broadcast %140 : vector<4x1xf32> to vector<4x256xf32>
    %143 = vector.broadcast %141 : vector<1x256xf32> to vector<4x256xf32>
    %144 = arith.mulf %142, %143 : vector<4x256xf32>
    %145 = arith.addf %139, %144 : vector<4x256xf32>
    %146 = vector.extract_strided_slice %17 {offsets = [0, 15], sizes = [4, 1], strides = [1, 1]} : vector<4x36xf32> to vector<4x1xf32>
    %147 = vector.extract_strided_slice %127 {offsets = [3, 0], sizes = [1, 256], strides = [1, 1]} : vector<4x256xf32> to vector<1x256xf32>
    %148 = vector.broadcast %146 : vector<4x1xf32> to vector<4x256xf32>
    %149 = vector.broadcast %147 : vector<1x256xf32> to vector<4x256xf32>
    %150 = arith.mulf %148, %149 : vector<4x256xf32>
    %151 = arith.addf %145, %150 : vector<4x256xf32>
    %152 = vector.extract_strided_slice %17 {offsets = [0, 16], sizes = [4, 1], strides = [1, 1]} : vector<4x36xf32> to vector<4x1xf32>
    %153 = vector.extract_strided_slice %24 {offsets = [0, 0], sizes = [1, 256], strides = [1, 1]} : vector<4x256xf32> to vector<1x256xf32>
    %154 = vector.broadcast %152 : vector<4x1xf32> to vector<4x256xf32>
    %155 = vector.broadcast %153 : vector<1x256xf32> to vector<4x256xf32>
    %156 = arith.mulf %154, %155 : vector<4x256xf32>
    %157 = arith.addf %151, %156 : vector<4x256xf32>
    %158 = vector.extract_strided_slice %17 {offsets = [0, 17], sizes = [4, 1], strides = [1, 1]} : vector<4x36xf32> to vector<4x1xf32>
    %159 = vector.extract_strided_slice %24 {offsets = [1, 0], sizes = [1, 256], strides = [1, 1]} : vector<4x256xf32> to vector<1x256xf32>
    %160 = vector.broadcast %158 : vector<4x1xf32> to vector<4x256xf32>
    %161 = vector.broadcast %159 : vector<1x256xf32> to vector<4x256xf32>
    %162 = arith.mulf %160, %161 : vector<4x256xf32>
    %163 = arith.addf %157, %162 : vector<4x256xf32>
    %164 = vector.extract_strided_slice %17 {offsets = [0, 18], sizes = [4, 1], strides = [1, 1]} : vector<4x36xf32> to vector<4x1xf32>
    %165 = vector.extract_strided_slice %24 {offsets = [2, 0], sizes = [1, 256], strides = [1, 1]} : vector<4x256xf32> to vector<1x256xf32>
    %166 = vector.broadcast %164 : vector<4x1xf32> to vector<4x256xf32>
    %167 = vector.broadcast %165 : vector<1x256xf32> to vector<4x256xf32>
    %168 = arith.mulf %166, %167 : vector<4x256xf32>
    %169 = arith.addf %163, %168 : vector<4x256xf32>
    %170 = vector.extract_strided_slice %17 {offsets = [0, 19], sizes = [4, 1], strides = [1, 1]} : vector<4x36xf32> to vector<4x1xf32>
    %171 = vector.extract_strided_slice %24 {offsets = [3, 0], sizes = [1, 256], strides = [1, 1]} : vector<4x256xf32> to vector<1x256xf32>
    %172 = vector.broadcast %170 : vector<4x1xf32> to vector<4x256xf32>
    %173 = vector.broadcast %171 : vector<1x256xf32> to vector<4x256xf32>
    %174 = arith.mulf %172, %173 : vector<4x256xf32>
    %175 = arith.addf %169, %174 : vector<4x256xf32>
    %176 = vector.extract_strided_slice %24 {offsets = [0, 1], sizes = [4, 255], strides = [1, 1]} : vector<4x256xf32> to vector<4x255xf32>
    %cst_23 = arith.constant 0.000000e+00 : f32
    %177 = vector.broadcast %cst_23 : f32 to vector<4x1xf32>
    %178 = tpu.concatenate %176, %177 in 1 : vector<4x255xf32>, vector<4x1xf32> -> vector<4x256xf32>
    %c15_i32_24 = arith.constant 15 : i32
    %179 = vector.broadcast %c15_i32_24 : i32 to vector<1x256xi32>
    %180 = arith.cmpi slt, %16, %179 : vector<1x256xi32>
    %cst_25 = arith.constant 0.000000e+00 : f32
    %181 = vector.shape_cast %180 : vector<1x256xi1> to vector<1x256xi1>
    %182 = vector.broadcast %181 : vector<1x256xi1> to vector<4x256xi1>
    %183 = vector.broadcast %cst_25 : f32 to vector<4x256xf32>
    %184 = arith.select %182, %178, %183 : vector<4x256xi1>, vector<4x256xf32>
    %185 = vector.extract_strided_slice %17 {offsets = [0, 20], sizes = [4, 1], strides = [1, 1]} : vector<4x36xf32> to vector<4x1xf32>
    %186 = vector.extract_strided_slice %184 {offsets = [0, 0], sizes = [1, 256], strides = [1, 1]} : vector<4x256xf32> to vector<1x256xf32>
    %187 = vector.broadcast %185 : vector<4x1xf32> to vector<4x256xf32>
    %188 = vector.broadcast %186 : vector<1x256xf32> to vector<4x256xf32>
    %189 = arith.mulf %187, %188 : vector<4x256xf32>
    %190 = arith.addf %175, %189 : vector<4x256xf32>
    %191 = vector.extract_strided_slice %17 {offsets = [0, 21], sizes = [4, 1], strides = [1, 1]} : vector<4x36xf32> to vector<4x1xf32>
    %192 = vector.extract_strided_slice %184 {offsets = [1, 0], sizes = [1, 256], strides = [1, 1]} : vector<4x256xf32> to vector<1x256xf32>
    %193 = vector.broadcast %191 : vector<4x1xf32> to vector<4x256xf32>
    %194 = vector.broadcast %192 : vector<1x256xf32> to vector<4x256xf32>
    %195 = arith.mulf %193, %194 : vector<4x256xf32>
    %196 = arith.addf %190, %195 : vector<4x256xf32>
    %197 = vector.extract_strided_slice %17 {offsets = [0, 22], sizes = [4, 1], strides = [1, 1]} : vector<4x36xf32> to vector<4x1xf32>
    %198 = vector.extract_strided_slice %184 {offsets = [2, 0], sizes = [1, 256], strides = [1, 1]} : vector<4x256xf32> to vector<1x256xf32>
    %199 = vector.broadcast %197 : vector<4x1xf32> to vector<4x256xf32>
    %200 = vector.broadcast %198 : vector<1x256xf32> to vector<4x256xf32>
    %201 = arith.mulf %199, %200 : vector<4x256xf32>
    %202 = arith.addf %196, %201 : vector<4x256xf32>
    %203 = vector.extract_strided_slice %17 {offsets = [0, 23], sizes = [4, 1], strides = [1, 1]} : vector<4x36xf32> to vector<4x1xf32>
    %204 = vector.extract_strided_slice %184 {offsets = [3, 0], sizes = [1, 256], strides = [1, 1]} : vector<4x256xf32> to vector<1x256xf32>
    %205 = vector.broadcast %203 : vector<4x1xf32> to vector<4x256xf32>
    %206 = vector.broadcast %204 : vector<1x256xf32> to vector<4x256xf32>
    %207 = arith.mulf %205, %206 : vector<4x256xf32>
    %208 = arith.addf %202, %207 : vector<4x256xf32>
    %209 = vector.extract_strided_slice %24 {offsets = [0, 15], sizes = [4, 241], strides = [1, 1]} : vector<4x256xf32> to vector<4x241xf32>
    %cst_26 = arith.constant 0.000000e+00 : f32
    %210 = vector.broadcast %cst_26 : f32 to vector<4x15xf32>
    %211 = tpu.concatenate %209, %210 in 1 : vector<4x241xf32>, vector<4x15xf32> -> vector<4x256xf32>
    %c1_i32_27 = arith.constant 1 : i32
    %212 = vector.broadcast %c1_i32_27 : i32 to vector<1x256xi32>
    %213 = arith.cmpi sge, %16, %212 : vector<1x256xi32>
    %cst_28 = arith.constant 0.000000e+00 : f32
    %214 = vector.shape_cast %213 : vector<1x256xi1> to vector<1x256xi1>
    %215 = vector.broadcast %214 : vector<1x256xi1> to vector<4x256xi1>
    %216 = vector.broadcast %cst_28 : f32 to vector<4x256xf32>
    %217 = arith.select %215, %211, %216 : vector<4x256xi1>, vector<4x256xf32>
    %218 = vector.extract_strided_slice %17 {offsets = [0, 24], sizes = [4, 1], strides = [1, 1]} : vector<4x36xf32> to vector<4x1xf32>
    %219 = vector.extract_strided_slice %217 {offsets = [0, 0], sizes = [1, 256], strides = [1, 1]} : vector<4x256xf32> to vector<1x256xf32>
    %220 = vector.broadcast %218 : vector<4x1xf32> to vector<4x256xf32>
    %221 = vector.broadcast %219 : vector<1x256xf32> to vector<4x256xf32>
    %222 = arith.mulf %220, %221 : vector<4x256xf32>
    %223 = arith.addf %208, %222 : vector<4x256xf32>
    %224 = vector.extract_strided_slice %17 {offsets = [0, 25], sizes = [4, 1], strides = [1, 1]} : vector<4x36xf32> to vector<4x1xf32>
    %225 = vector.extract_strided_slice %217 {offsets = [1, 0], sizes = [1, 256], strides = [1, 1]} : vector<4x256xf32> to vector<1x256xf32>
    %226 = vector.broadcast %224 : vector<4x1xf32> to vector<4x256xf32>
    %227 = vector.broadcast %225 : vector<1x256xf32> to vector<4x256xf32>
    %228 = arith.mulf %226, %227 : vector<4x256xf32>
    %229 = arith.addf %223, %228 : vector<4x256xf32>
    %230 = vector.extract_strided_slice %17 {offsets = [0, 26], sizes = [4, 1], strides = [1, 1]} : vector<4x36xf32> to vector<4x1xf32>
    %231 = vector.extract_strided_slice %217 {offsets = [2, 0], sizes = [1, 256], strides = [1, 1]} : vector<4x256xf32> to vector<1x256xf32>
    %232 = vector.broadcast %230 : vector<4x1xf32> to vector<4x256xf32>
    %233 = vector.broadcast %231 : vector<1x256xf32> to vector<4x256xf32>
    %234 = arith.mulf %232, %233 : vector<4x256xf32>
    %235 = arith.addf %229, %234 : vector<4x256xf32>
    %236 = vector.extract_strided_slice %17 {offsets = [0, 27], sizes = [4, 1], strides = [1, 1]} : vector<4x36xf32> to vector<4x1xf32>
    %237 = vector.extract_strided_slice %217 {offsets = [3, 0], sizes = [1, 256], strides = [1, 1]} : vector<4x256xf32> to vector<1x256xf32>
    %238 = vector.broadcast %236 : vector<4x1xf32> to vector<4x256xf32>
    %239 = vector.broadcast %237 : vector<1x256xf32> to vector<4x256xf32>
    %240 = arith.mulf %238, %239 : vector<4x256xf32>
    %241 = arith.addf %235, %240 : vector<4x256xf32>
    %242 = vector.extract_strided_slice %24 {offsets = [0, 16], sizes = [4, 240], strides = [1, 1]} : vector<4x256xf32> to vector<4x240xf32>
    %cst_29 = arith.constant 0.000000e+00 : f32
    %243 = vector.broadcast %cst_29 : f32 to vector<4x16xf32>
    %244 = tpu.concatenate %242, %243 in 1 : vector<4x240xf32>, vector<4x16xf32> -> vector<4x256xf32>
    %245 = vector.extract_strided_slice %17 {offsets = [0, 28], sizes = [4, 1], strides = [1, 1]} : vector<4x36xf32> to vector<4x1xf32>
    %246 = vector.extract_strided_slice %244 {offsets = [0, 0], sizes = [1, 256], strides = [1, 1]} : vector<4x256xf32> to vector<1x256xf32>
    %247 = vector.broadcast %245 : vector<4x1xf32> to vector<4x256xf32>
    %248 = vector.broadcast %246 : vector<1x256xf32> to vector<4x256xf32>
    %249 = arith.mulf %247, %248 : vector<4x256xf32>
    %250 = arith.addf %241, %249 : vector<4x256xf32>
    %251 = vector.extract_strided_slice %17 {offsets = [0, 29], sizes = [4, 1], strides = [1, 1]} : vector<4x36xf32> to vector<4x1xf32>
    %252 = vector.extract_strided_slice %244 {offsets = [1, 0], sizes = [1, 256], strides = [1, 1]} : vector<4x256xf32> to vector<1x256xf32>
    %253 = vector.broadcast %251 : vector<4x1xf32> to vector<4x256xf32>
    %254 = vector.broadcast %252 : vector<1x256xf32> to vector<4x256xf32>
    %255 = arith.mulf %253, %254 : vector<4x256xf32>
    %256 = arith.addf %250, %255 : vector<4x256xf32>
    %257 = vector.extract_strided_slice %17 {offsets = [0, 30], sizes = [4, 1], strides = [1, 1]} : vector<4x36xf32> to vector<4x1xf32>
    %258 = vector.extract_strided_slice %244 {offsets = [2, 0], sizes = [1, 256], strides = [1, 1]} : vector<4x256xf32> to vector<1x256xf32>
    %259 = vector.broadcast %257 : vector<4x1xf32> to vector<4x256xf32>
    %260 = vector.broadcast %258 : vector<1x256xf32> to vector<4x256xf32>
    %261 = arith.mulf %259, %260 : vector<4x256xf32>
    %262 = arith.addf %256, %261 : vector<4x256xf32>
    %263 = vector.extract_strided_slice %17 {offsets = [0, 31], sizes = [4, 1], strides = [1, 1]} : vector<4x36xf32> to vector<4x1xf32>
    %264 = vector.extract_strided_slice %244 {offsets = [3, 0], sizes = [1, 256], strides = [1, 1]} : vector<4x256xf32> to vector<1x256xf32>
    %265 = vector.broadcast %263 : vector<4x1xf32> to vector<4x256xf32>
    %266 = vector.broadcast %264 : vector<1x256xf32> to vector<4x256xf32>
    %267 = arith.mulf %265, %266 : vector<4x256xf32>
    %268 = arith.addf %262, %267 : vector<4x256xf32>
    %269 = vector.extract_strided_slice %24 {offsets = [0, 17], sizes = [4, 239], strides = [1, 1]} : vector<4x256xf32> to vector<4x239xf32>
    %cst_30 = arith.constant 0.000000e+00 : f32
    %270 = vector.broadcast %cst_30 : f32 to vector<4x17xf32>
    %271 = tpu.concatenate %269, %270 in 1 : vector<4x239xf32>, vector<4x17xf32> -> vector<4x256xf32>
    %c15_i32_31 = arith.constant 15 : i32
    %272 = vector.broadcast %c15_i32_31 : i32 to vector<1x256xi32>
    %273 = arith.cmpi slt, %16, %272 : vector<1x256xi32>
    %cst_32 = arith.constant 0.000000e+00 : f32
    %274 = vector.shape_cast %273 : vector<1x256xi1> to vector<1x256xi1>
    %275 = vector.broadcast %274 : vector<1x256xi1> to vector<4x256xi1>
    %276 = vector.broadcast %cst_32 : f32 to vector<4x256xf32>
    %277 = arith.select %275, %271, %276 : vector<4x256xi1>, vector<4x256xf32>
    %278 = vector.extract_strided_slice %17 {offsets = [0, 32], sizes = [4, 1], strides = [1, 1]} : vector<4x36xf32> to vector<4x1xf32>
    %279 = vector.extract_strided_slice %277 {offsets = [0, 0], sizes = [1, 256], strides = [1, 1]} : vector<4x256xf32> to vector<1x256xf32>
    %280 = vector.broadcast %278 : vector<4x1xf32> to vector<4x256xf32>
    %281 = vector.broadcast %279 : vector<1x256xf32> to vector<4x256xf32>
    %282 = arith.mulf %280, %281 : vector<4x256xf32>
    %283 = arith.addf %268, %282 : vector<4x256xf32>
    %284 = vector.extract_strided_slice %17 {offsets = [0, 33], sizes = [4, 1], strides = [1, 1]} : vector<4x36xf32> to vector<4x1xf32>
    %285 = vector.extract_strided_slice %277 {offsets = [1, 0], sizes = [1, 256], strides = [1, 1]} : vector<4x256xf32> to vector<1x256xf32>
    %286 = vector.broadcast %284 : vector<4x1xf32> to vector<4x256xf32>
    %287 = vector.broadcast %285 : vector<1x256xf32> to vector<4x256xf32>
    %288 = arith.mulf %286, %287 : vector<4x256xf32>
    %289 = arith.addf %283, %288 : vector<4x256xf32>
    %290 = vector.extract_strided_slice %17 {offsets = [0, 34], sizes = [4, 1], strides = [1, 1]} : vector<4x36xf32> to vector<4x1xf32>
    %291 = vector.extract_strided_slice %277 {offsets = [2, 0], sizes = [1, 256], strides = [1, 1]} : vector<4x256xf32> to vector<1x256xf32>
    %292 = vector.broadcast %290 : vector<4x1xf32> to vector<4x256xf32>
    %293 = vector.broadcast %291 : vector<1x256xf32> to vector<4x256xf32>
    %294 = arith.mulf %292, %293 : vector<4x256xf32>
    %295 = arith.addf %289, %294 : vector<4x256xf32>
    %296 = vector.extract_strided_slice %17 {offsets = [0, 35], sizes = [4, 1], strides = [1, 1]} : vector<4x36xf32> to vector<4x1xf32>
    %297 = vector.extract_strided_slice %277 {offsets = [3, 0], sizes = [1, 256], strides = [1, 1]} : vector<4x256xf32> to vector<1x256xf32>
    %298 = vector.broadcast %296 : vector<4x1xf32> to vector<4x256xf32>
    %299 = vector.broadcast %297 : vector<1x256xf32> to vector<4x256xf32>
    %300 = arith.mulf %298, %299 : vector<4x256xf32>
    %301 = arith.addf %295, %300 : vector<4x256xf32>
    %302 = vector.broadcast %18 : vector<4x1xf32> to vector<4x256xf32>
    %303 = arith.addf %301, %302 : vector<4x256xf32>
    %cst_33 = arith.constant 0.000000e+00 : f32
    %304 = vector.broadcast %cst_33 : f32 to vector<4x256xf32>
    %305 = arith.maximumf %303, %304 : vector<4x256xf32>
    %cst_34 = arith.constant 0.000000e+00 : f32
    %306 = vector.broadcast %cst_34 : f32 to vector<4x256xf32>
    %cst_35 = arith.constant 0.000000e+00 : f32
    %307 = vector.broadcast %cst_35 : f32 to vector<4x17xf32>
    %308 = vector.extract_strided_slice %305 {offsets = [0, 0], sizes = [4, 239], strides = [1, 1]} : vector<4x256xf32> to vector<4x239xf32>
    %309 = tpu.concatenate %307, %308 in 1 : vector<4x17xf32>, vector<4x239xf32> -> vector<4x256xf32>
    %c1_i32_36 = arith.constant 1 : i32
    %310 = vector.broadcast %c1_i32_36 : i32 to vector<1x256xi32>
    %311 = arith.cmpi sge, %16, %310 : vector<1x256xi32>
    %cst_37 = arith.constant 0.000000e+00 : f32
    %312 = vector.shape_cast %311 : vector<1x256xi1> to vector<1x256xi1>
    %313 = vector.broadcast %312 : vector<1x256xi1> to vector<4x256xi1>
    %314 = vector.broadcast %cst_37 : f32 to vector<4x256xf32>
    %315 = arith.select %313, %309, %314 : vector<4x256xi1>, vector<4x256xf32>
    %316 = vector.extract_strided_slice %19 {offsets = [0, 0], sizes = [4, 1], strides = [1, 1]} : vector<4x36xf32> to vector<4x1xf32>
    %317 = vector.extract_strided_slice %315 {offsets = [0, 0], sizes = [1, 256], strides = [1, 1]} : vector<4x256xf32> to vector<1x256xf32>
    %318 = vector.broadcast %316 : vector<4x1xf32> to vector<4x256xf32>
    %319 = vector.broadcast %317 : vector<1x256xf32> to vector<4x256xf32>
    %320 = arith.mulf %318, %319 : vector<4x256xf32>
    %321 = arith.addf %306, %320 : vector<4x256xf32>
    %322 = vector.extract_strided_slice %19 {offsets = [0, 1], sizes = [4, 1], strides = [1, 1]} : vector<4x36xf32> to vector<4x1xf32>
    %323 = vector.extract_strided_slice %315 {offsets = [1, 0], sizes = [1, 256], strides = [1, 1]} : vector<4x256xf32> to vector<1x256xf32>
    %324 = vector.broadcast %322 : vector<4x1xf32> to vector<4x256xf32>
    %325 = vector.broadcast %323 : vector<1x256xf32> to vector<4x256xf32>
    %326 = arith.mulf %324, %325 : vector<4x256xf32>
    %327 = arith.addf %321, %326 : vector<4x256xf32>
    %328 = vector.extract_strided_slice %19 {offsets = [0, 2], sizes = [4, 1], strides = [1, 1]} : vector<4x36xf32> to vector<4x1xf32>
    %329 = vector.extract_strided_slice %315 {offsets = [2, 0], sizes = [1, 256], strides = [1, 1]} : vector<4x256xf32> to vector<1x256xf32>
    %330 = vector.broadcast %328 : vector<4x1xf32> to vector<4x256xf32>
    %331 = vector.broadcast %329 : vector<1x256xf32> to vector<4x256xf32>
    %332 = arith.mulf %330, %331 : vector<4x256xf32>
    %333 = arith.addf %327, %332 : vector<4x256xf32>
    %334 = vector.extract_strided_slice %19 {offsets = [0, 3], sizes = [4, 1], strides = [1, 1]} : vector<4x36xf32> to vector<4x1xf32>
    %335 = vector.extract_strided_slice %315 {offsets = [3, 0], sizes = [1, 256], strides = [1, 1]} : vector<4x256xf32> to vector<1x256xf32>
    %336 = vector.broadcast %334 : vector<4x1xf32> to vector<4x256xf32>
    %337 = vector.broadcast %335 : vector<1x256xf32> to vector<4x256xf32>
    %338 = arith.mulf %336, %337 : vector<4x256xf32>
    %339 = arith.addf %333, %338 : vector<4x256xf32>
    %cst_38 = arith.constant 0.000000e+00 : f32
    %340 = vector.broadcast %cst_38 : f32 to vector<4x16xf32>
    %341 = vector.extract_strided_slice %305 {offsets = [0, 0], sizes = [4, 240], strides = [1, 1]} : vector<4x256xf32> to vector<4x240xf32>
    %342 = tpu.concatenate %340, %341 in 1 : vector<4x16xf32>, vector<4x240xf32> -> vector<4x256xf32>
    %343 = vector.extract_strided_slice %19 {offsets = [0, 4], sizes = [4, 1], strides = [1, 1]} : vector<4x36xf32> to vector<4x1xf32>
    %344 = vector.extract_strided_slice %342 {offsets = [0, 0], sizes = [1, 256], strides = [1, 1]} : vector<4x256xf32> to vector<1x256xf32>
    %345 = vector.broadcast %343 : vector<4x1xf32> to vector<4x256xf32>
    %346 = vector.broadcast %344 : vector<1x256xf32> to vector<4x256xf32>
    %347 = arith.mulf %345, %346 : vector<4x256xf32>
    %348 = arith.addf %339, %347 : vector<4x256xf32>
    %349 = vector.extract_strided_slice %19 {offsets = [0, 5], sizes = [4, 1], strides = [1, 1]} : vector<4x36xf32> to vector<4x1xf32>
    %350 = vector.extract_strided_slice %342 {offsets = [1, 0], sizes = [1, 256], strides = [1, 1]} : vector<4x256xf32> to vector<1x256xf32>
    %351 = vector.broadcast %349 : vector<4x1xf32> to vector<4x256xf32>
    %352 = vector.broadcast %350 : vector<1x256xf32> to vector<4x256xf32>
    %353 = arith.mulf %351, %352 : vector<4x256xf32>
    %354 = arith.addf %348, %353 : vector<4x256xf32>
    %355 = vector.extract_strided_slice %19 {offsets = [0, 6], sizes = [4, 1], strides = [1, 1]} : vector<4x36xf32> to vector<4x1xf32>
    %356 = vector.extract_strided_slice %342 {offsets = [2, 0], sizes = [1, 256], strides = [1, 1]} : vector<4x256xf32> to vector<1x256xf32>
    %357 = vector.broadcast %355 : vector<4x1xf32> to vector<4x256xf32>
    %358 = vector.broadcast %356 : vector<1x256xf32> to vector<4x256xf32>
    %359 = arith.mulf %357, %358 : vector<4x256xf32>
    %360 = arith.addf %354, %359 : vector<4x256xf32>
    %361 = vector.extract_strided_slice %19 {offsets = [0, 7], sizes = [4, 1], strides = [1, 1]} : vector<4x36xf32> to vector<4x1xf32>
    %362 = vector.extract_strided_slice %342 {offsets = [3, 0], sizes = [1, 256], strides = [1, 1]} : vector<4x256xf32> to vector<1x256xf32>
    %363 = vector.broadcast %361 : vector<4x1xf32> to vector<4x256xf32>
    %364 = vector.broadcast %362 : vector<1x256xf32> to vector<4x256xf32>
    %365 = arith.mulf %363, %364 : vector<4x256xf32>
    %366 = arith.addf %360, %365 : vector<4x256xf32>
    %cst_39 = arith.constant 0.000000e+00 : f32
    %367 = vector.broadcast %cst_39 : f32 to vector<4x15xf32>
    %368 = vector.extract_strided_slice %305 {offsets = [0, 0], sizes = [4, 241], strides = [1, 1]} : vector<4x256xf32> to vector<4x241xf32>
    %369 = tpu.concatenate %367, %368 in 1 : vector<4x15xf32>, vector<4x241xf32> -> vector<4x256xf32>
    %c15_i32_40 = arith.constant 15 : i32
    %370 = vector.broadcast %c15_i32_40 : i32 to vector<1x256xi32>
    %371 = arith.cmpi slt, %16, %370 : vector<1x256xi32>
    %cst_41 = arith.constant 0.000000e+00 : f32
    %372 = vector.shape_cast %371 : vector<1x256xi1> to vector<1x256xi1>
    %373 = vector.broadcast %372 : vector<1x256xi1> to vector<4x256xi1>
    %374 = vector.broadcast %cst_41 : f32 to vector<4x256xf32>
    %375 = arith.select %373, %369, %374 : vector<4x256xi1>, vector<4x256xf32>
    %376 = vector.extract_strided_slice %19 {offsets = [0, 8], sizes = [4, 1], strides = [1, 1]} : vector<4x36xf32> to vector<4x1xf32>
    %377 = vector.extract_strided_slice %375 {offsets = [0, 0], sizes = [1, 256], strides = [1, 1]} : vector<4x256xf32> to vector<1x256xf32>
    %378 = vector.broadcast %376 : vector<4x1xf32> to vector<4x256xf32>
    %379 = vector.broadcast %377 : vector<1x256xf32> to vector<4x256xf32>
    %380 = arith.mulf %378, %379 : vector<4x256xf32>
    %381 = arith.addf %366, %380 : vector<4x256xf32>
    %382 = vector.extract_strided_slice %19 {offsets = [0, 9], sizes = [4, 1], strides = [1, 1]} : vector<4x36xf32> to vector<4x1xf32>
    %383 = vector.extract_strided_slice %375 {offsets = [1, 0], sizes = [1, 256], strides = [1, 1]} : vector<4x256xf32> to vector<1x256xf32>
    %384 = vector.broadcast %382 : vector<4x1xf32> to vector<4x256xf32>
    %385 = vector.broadcast %383 : vector<1x256xf32> to vector<4x256xf32>
    %386 = arith.mulf %384, %385 : vector<4x256xf32>
    %387 = arith.addf %381, %386 : vector<4x256xf32>
    %388 = vector.extract_strided_slice %19 {offsets = [0, 10], sizes = [4, 1], strides = [1, 1]} : vector<4x36xf32> to vector<4x1xf32>
    %389 = vector.extract_strided_slice %375 {offsets = [2, 0], sizes = [1, 256], strides = [1, 1]} : vector<4x256xf32> to vector<1x256xf32>
    %390 = vector.broadcast %388 : vector<4x1xf32> to vector<4x256xf32>
    %391 = vector.broadcast %389 : vector<1x256xf32> to vector<4x256xf32>
    %392 = arith.mulf %390, %391 : vector<4x256xf32>
    %393 = arith.addf %387, %392 : vector<4x256xf32>
    %394 = vector.extract_strided_slice %19 {offsets = [0, 11], sizes = [4, 1], strides = [1, 1]} : vector<4x36xf32> to vector<4x1xf32>
    %395 = vector.extract_strided_slice %375 {offsets = [3, 0], sizes = [1, 256], strides = [1, 1]} : vector<4x256xf32> to vector<1x256xf32>
    %396 = vector.broadcast %394 : vector<4x1xf32> to vector<4x256xf32>
    %397 = vector.broadcast %395 : vector<1x256xf32> to vector<4x256xf32>
    %398 = arith.mulf %396, %397 : vector<4x256xf32>
    %399 = arith.addf %393, %398 : vector<4x256xf32>
    %cst_42 = arith.constant 0.000000e+00 : f32
    %400 = vector.broadcast %cst_42 : f32 to vector<4x1xf32>
    %401 = vector.extract_strided_slice %305 {offsets = [0, 0], sizes = [4, 255], strides = [1, 1]} : vector<4x256xf32> to vector<4x255xf32>
    %402 = tpu.concatenate %400, %401 in 1 : vector<4x1xf32>, vector<4x255xf32> -> vector<4x256xf32>
    %c1_i32_43 = arith.constant 1 : i32
    %403 = vector.broadcast %c1_i32_43 : i32 to vector<1x256xi32>
    %404 = arith.cmpi sge, %16, %403 : vector<1x256xi32>
    %cst_44 = arith.constant 0.000000e+00 : f32
    %405 = vector.shape_cast %404 : vector<1x256xi1> to vector<1x256xi1>
    %406 = vector.broadcast %405 : vector<1x256xi1> to vector<4x256xi1>
    %407 = vector.broadcast %cst_44 : f32 to vector<4x256xf32>
    %408 = arith.select %406, %402, %407 : vector<4x256xi1>, vector<4x256xf32>
    %409 = vector.extract_strided_slice %19 {offsets = [0, 12], sizes = [4, 1], strides = [1, 1]} : vector<4x36xf32> to vector<4x1xf32>
    %410 = vector.extract_strided_slice %408 {offsets = [0, 0], sizes = [1, 256], strides = [1, 1]} : vector<4x256xf32> to vector<1x256xf32>
    %411 = vector.broadcast %409 : vector<4x1xf32> to vector<4x256xf32>
    %412 = vector.broadcast %410 : vector<1x256xf32> to vector<4x256xf32>
    %413 = arith.mulf %411, %412 : vector<4x256xf32>
    %414 = arith.addf %399, %413 : vector<4x256xf32>
    %415 = vector.extract_strided_slice %19 {offsets = [0, 13], sizes = [4, 1], strides = [1, 1]} : vector<4x36xf32> to vector<4x1xf32>
    %416 = vector.extract_strided_slice %408 {offsets = [1, 0], sizes = [1, 256], strides = [1, 1]} : vector<4x256xf32> to vector<1x256xf32>
    %417 = vector.broadcast %415 : vector<4x1xf32> to vector<4x256xf32>
    %418 = vector.broadcast %416 : vector<1x256xf32> to vector<4x256xf32>
    %419 = arith.mulf %417, %418 : vector<4x256xf32>
    %420 = arith.addf %414, %419 : vector<4x256xf32>
    %421 = vector.extract_strided_slice %19 {offsets = [0, 14], sizes = [4, 1], strides = [1, 1]} : vector<4x36xf32> to vector<4x1xf32>
    %422 = vector.extract_strided_slice %408 {offsets = [2, 0], sizes = [1, 256], strides = [1, 1]} : vector<4x256xf32> to vector<1x256xf32>
    %423 = vector.broadcast %421 : vector<4x1xf32> to vector<4x256xf32>
    %424 = vector.broadcast %422 : vector<1x256xf32> to vector<4x256xf32>
    %425 = arith.mulf %423, %424 : vector<4x256xf32>
    %426 = arith.addf %420, %425 : vector<4x256xf32>
    %427 = vector.extract_strided_slice %19 {offsets = [0, 15], sizes = [4, 1], strides = [1, 1]} : vector<4x36xf32> to vector<4x1xf32>
    %428 = vector.extract_strided_slice %408 {offsets = [3, 0], sizes = [1, 256], strides = [1, 1]} : vector<4x256xf32> to vector<1x256xf32>
    %429 = vector.broadcast %427 : vector<4x1xf32> to vector<4x256xf32>
    %430 = vector.broadcast %428 : vector<1x256xf32> to vector<4x256xf32>
    %431 = arith.mulf %429, %430 : vector<4x256xf32>
    %432 = arith.addf %426, %431 : vector<4x256xf32>
    %433 = vector.extract_strided_slice %19 {offsets = [0, 16], sizes = [4, 1], strides = [1, 1]} : vector<4x36xf32> to vector<4x1xf32>
    %434 = vector.extract_strided_slice %305 {offsets = [0, 0], sizes = [1, 256], strides = [1, 1]} : vector<4x256xf32> to vector<1x256xf32>
    %435 = vector.broadcast %433 : vector<4x1xf32> to vector<4x256xf32>
    %436 = vector.broadcast %434 : vector<1x256xf32> to vector<4x256xf32>
    %437 = arith.mulf %435, %436 : vector<4x256xf32>
    %438 = arith.addf %432, %437 : vector<4x256xf32>
    %439 = vector.extract_strided_slice %19 {offsets = [0, 17], sizes = [4, 1], strides = [1, 1]} : vector<4x36xf32> to vector<4x1xf32>
    %440 = vector.extract_strided_slice %305 {offsets = [1, 0], sizes = [1, 256], strides = [1, 1]} : vector<4x256xf32> to vector<1x256xf32>
    %441 = vector.broadcast %439 : vector<4x1xf32> to vector<4x256xf32>
    %442 = vector.broadcast %440 : vector<1x256xf32> to vector<4x256xf32>
    %443 = arith.mulf %441, %442 : vector<4x256xf32>
    %444 = arith.addf %438, %443 : vector<4x256xf32>
    %445 = vector.extract_strided_slice %19 {offsets = [0, 18], sizes = [4, 1], strides = [1, 1]} : vector<4x36xf32> to vector<4x1xf32>
    %446 = vector.extract_strided_slice %305 {offsets = [2, 0], sizes = [1, 256], strides = [1, 1]} : vector<4x256xf32> to vector<1x256xf32>
    %447 = vector.broadcast %445 : vector<4x1xf32> to vector<4x256xf32>
    %448 = vector.broadcast %446 : vector<1x256xf32> to vector<4x256xf32>
    %449 = arith.mulf %447, %448 : vector<4x256xf32>
    %450 = arith.addf %444, %449 : vector<4x256xf32>
    %451 = vector.extract_strided_slice %19 {offsets = [0, 19], sizes = [4, 1], strides = [1, 1]} : vector<4x36xf32> to vector<4x1xf32>
    %452 = vector.extract_strided_slice %305 {offsets = [3, 0], sizes = [1, 256], strides = [1, 1]} : vector<4x256xf32> to vector<1x256xf32>
    %453 = vector.broadcast %451 : vector<4x1xf32> to vector<4x256xf32>
    %454 = vector.broadcast %452 : vector<1x256xf32> to vector<4x256xf32>
    %455 = arith.mulf %453, %454 : vector<4x256xf32>
    %456 = arith.addf %450, %455 : vector<4x256xf32>
    %457 = vector.extract_strided_slice %305 {offsets = [0, 1], sizes = [4, 255], strides = [1, 1]} : vector<4x256xf32> to vector<4x255xf32>
    %cst_45 = arith.constant 0.000000e+00 : f32
    %458 = vector.broadcast %cst_45 : f32 to vector<4x1xf32>
    %459 = tpu.concatenate %457, %458 in 1 : vector<4x255xf32>, vector<4x1xf32> -> vector<4x256xf32>
    %c15_i32_46 = arith.constant 15 : i32
    %460 = vector.broadcast %c15_i32_46 : i32 to vector<1x256xi32>
    %461 = arith.cmpi slt, %16, %460 : vector<1x256xi32>
    %cst_47 = arith.constant 0.000000e+00 : f32
    %462 = vector.shape_cast %461 : vector<1x256xi1> to vector<1x256xi1>
    %463 = vector.broadcast %462 : vector<1x256xi1> to vector<4x256xi1>
    %464 = vector.broadcast %cst_47 : f32 to vector<4x256xf32>
    %465 = arith.select %463, %459, %464 : vector<4x256xi1>, vector<4x256xf32>
    %466 = vector.extract_strided_slice %19 {offsets = [0, 20], sizes = [4, 1], strides = [1, 1]} : vector<4x36xf32> to vector<4x1xf32>
    %467 = vector.extract_strided_slice %465 {offsets = [0, 0], sizes = [1, 256], strides = [1, 1]} : vector<4x256xf32> to vector<1x256xf32>
    %468 = vector.broadcast %466 : vector<4x1xf32> to vector<4x256xf32>
    %469 = vector.broadcast %467 : vector<1x256xf32> to vector<4x256xf32>
    %470 = arith.mulf %468, %469 : vector<4x256xf32>
    %471 = arith.addf %456, %470 : vector<4x256xf32>
    %472 = vector.extract_strided_slice %19 {offsets = [0, 21], sizes = [4, 1], strides = [1, 1]} : vector<4x36xf32> to vector<4x1xf32>
    %473 = vector.extract_strided_slice %465 {offsets = [1, 0], sizes = [1, 256], strides = [1, 1]} : vector<4x256xf32> to vector<1x256xf32>
    %474 = vector.broadcast %472 : vector<4x1xf32> to vector<4x256xf32>
    %475 = vector.broadcast %473 : vector<1x256xf32> to vector<4x256xf32>
    %476 = arith.mulf %474, %475 : vector<4x256xf32>
    %477 = arith.addf %471, %476 : vector<4x256xf32>
    %478 = vector.extract_strided_slice %19 {offsets = [0, 22], sizes = [4, 1], strides = [1, 1]} : vector<4x36xf32> to vector<4x1xf32>
    %479 = vector.extract_strided_slice %465 {offsets = [2, 0], sizes = [1, 256], strides = [1, 1]} : vector<4x256xf32> to vector<1x256xf32>
    %480 = vector.broadcast %478 : vector<4x1xf32> to vector<4x256xf32>
    %481 = vector.broadcast %479 : vector<1x256xf32> to vector<4x256xf32>
    %482 = arith.mulf %480, %481 : vector<4x256xf32>
    %483 = arith.addf %477, %482 : vector<4x256xf32>
    %484 = vector.extract_strided_slice %19 {offsets = [0, 23], sizes = [4, 1], strides = [1, 1]} : vector<4x36xf32> to vector<4x1xf32>
    %485 = vector.extract_strided_slice %465 {offsets = [3, 0], sizes = [1, 256], strides = [1, 1]} : vector<4x256xf32> to vector<1x256xf32>
    %486 = vector.broadcast %484 : vector<4x1xf32> to vector<4x256xf32>
    %487 = vector.broadcast %485 : vector<1x256xf32> to vector<4x256xf32>
    %488 = arith.mulf %486, %487 : vector<4x256xf32>
    %489 = arith.addf %483, %488 : vector<4x256xf32>
    %490 = vector.extract_strided_slice %305 {offsets = [0, 15], sizes = [4, 241], strides = [1, 1]} : vector<4x256xf32> to vector<4x241xf32>
    %cst_48 = arith.constant 0.000000e+00 : f32
    %491 = vector.broadcast %cst_48 : f32 to vector<4x15xf32>
    %492 = tpu.concatenate %490, %491 in 1 : vector<4x241xf32>, vector<4x15xf32> -> vector<4x256xf32>
    %c1_i32_49 = arith.constant 1 : i32
    %493 = vector.broadcast %c1_i32_49 : i32 to vector<1x256xi32>
    %494 = arith.cmpi sge, %16, %493 : vector<1x256xi32>
    %cst_50 = arith.constant 0.000000e+00 : f32
    %495 = vector.shape_cast %494 : vector<1x256xi1> to vector<1x256xi1>
    %496 = vector.broadcast %495 : vector<1x256xi1> to vector<4x256xi1>
    %497 = vector.broadcast %cst_50 : f32 to vector<4x256xf32>
    %498 = arith.select %496, %492, %497 : vector<4x256xi1>, vector<4x256xf32>
    %499 = vector.extract_strided_slice %19 {offsets = [0, 24], sizes = [4, 1], strides = [1, 1]} : vector<4x36xf32> to vector<4x1xf32>
    %500 = vector.extract_strided_slice %498 {offsets = [0, 0], sizes = [1, 256], strides = [1, 1]} : vector<4x256xf32> to vector<1x256xf32>
    %501 = vector.broadcast %499 : vector<4x1xf32> to vector<4x256xf32>
    %502 = vector.broadcast %500 : vector<1x256xf32> to vector<4x256xf32>
    %503 = arith.mulf %501, %502 : vector<4x256xf32>
    %504 = arith.addf %489, %503 : vector<4x256xf32>
    %505 = vector.extract_strided_slice %19 {offsets = [0, 25], sizes = [4, 1], strides = [1, 1]} : vector<4x36xf32> to vector<4x1xf32>
    %506 = vector.extract_strided_slice %498 {offsets = [1, 0], sizes = [1, 256], strides = [1, 1]} : vector<4x256xf32> to vector<1x256xf32>
    %507 = vector.broadcast %505 : vector<4x1xf32> to vector<4x256xf32>
    %508 = vector.broadcast %506 : vector<1x256xf32> to vector<4x256xf32>
    %509 = arith.mulf %507, %508 : vector<4x256xf32>
    %510 = arith.addf %504, %509 : vector<4x256xf32>
    %511 = vector.extract_strided_slice %19 {offsets = [0, 26], sizes = [4, 1], strides = [1, 1]} : vector<4x36xf32> to vector<4x1xf32>
    %512 = vector.extract_strided_slice %498 {offsets = [2, 0], sizes = [1, 256], strides = [1, 1]} : vector<4x256xf32> to vector<1x256xf32>
    %513 = vector.broadcast %511 : vector<4x1xf32> to vector<4x256xf32>
    %514 = vector.broadcast %512 : vector<1x256xf32> to vector<4x256xf32>
    %515 = arith.mulf %513, %514 : vector<4x256xf32>
    %516 = arith.addf %510, %515 : vector<4x256xf32>
    %517 = vector.extract_strided_slice %19 {offsets = [0, 27], sizes = [4, 1], strides = [1, 1]} : vector<4x36xf32> to vector<4x1xf32>
    %518 = vector.extract_strided_slice %498 {offsets = [3, 0], sizes = [1, 256], strides = [1, 1]} : vector<4x256xf32> to vector<1x256xf32>
    %519 = vector.broadcast %517 : vector<4x1xf32> to vector<4x256xf32>
    %520 = vector.broadcast %518 : vector<1x256xf32> to vector<4x256xf32>
    %521 = arith.mulf %519, %520 : vector<4x256xf32>
    %522 = arith.addf %516, %521 : vector<4x256xf32>
    %523 = vector.extract_strided_slice %305 {offsets = [0, 16], sizes = [4, 240], strides = [1, 1]} : vector<4x256xf32> to vector<4x240xf32>
    %cst_51 = arith.constant 0.000000e+00 : f32
    %524 = vector.broadcast %cst_51 : f32 to vector<4x16xf32>
    %525 = tpu.concatenate %523, %524 in 1 : vector<4x240xf32>, vector<4x16xf32> -> vector<4x256xf32>
    %526 = vector.extract_strided_slice %19 {offsets = [0, 28], sizes = [4, 1], strides = [1, 1]} : vector<4x36xf32> to vector<4x1xf32>
    %527 = vector.extract_strided_slice %525 {offsets = [0, 0], sizes = [1, 256], strides = [1, 1]} : vector<4x256xf32> to vector<1x256xf32>
    %528 = vector.broadcast %526 : vector<4x1xf32> to vector<4x256xf32>
    %529 = vector.broadcast %527 : vector<1x256xf32> to vector<4x256xf32>
    %530 = arith.mulf %528, %529 : vector<4x256xf32>
    %531 = arith.addf %522, %530 : vector<4x256xf32>
    %532 = vector.extract_strided_slice %19 {offsets = [0, 29], sizes = [4, 1], strides = [1, 1]} : vector<4x36xf32> to vector<4x1xf32>
    %533 = vector.extract_strided_slice %525 {offsets = [1, 0], sizes = [1, 256], strides = [1, 1]} : vector<4x256xf32> to vector<1x256xf32>
    %534 = vector.broadcast %532 : vector<4x1xf32> to vector<4x256xf32>
    %535 = vector.broadcast %533 : vector<1x256xf32> to vector<4x256xf32>
    %536 = arith.mulf %534, %535 : vector<4x256xf32>
    %537 = arith.addf %531, %536 : vector<4x256xf32>
    %538 = vector.extract_strided_slice %19 {offsets = [0, 30], sizes = [4, 1], strides = [1, 1]} : vector<4x36xf32> to vector<4x1xf32>
    %539 = vector.extract_strided_slice %525 {offsets = [2, 0], sizes = [1, 256], strides = [1, 1]} : vector<4x256xf32> to vector<1x256xf32>
    %540 = vector.broadcast %538 : vector<4x1xf32> to vector<4x256xf32>
    %541 = vector.broadcast %539 : vector<1x256xf32> to vector<4x256xf32>
    %542 = arith.mulf %540, %541 : vector<4x256xf32>
    %543 = arith.addf %537, %542 : vector<4x256xf32>
    %544 = vector.extract_strided_slice %19 {offsets = [0, 31], sizes = [4, 1], strides = [1, 1]} : vector<4x36xf32> to vector<4x1xf32>
    %545 = vector.extract_strided_slice %525 {offsets = [3, 0], sizes = [1, 256], strides = [1, 1]} : vector<4x256xf32> to vector<1x256xf32>
    %546 = vector.broadcast %544 : vector<4x1xf32> to vector<4x256xf32>
    %547 = vector.broadcast %545 : vector<1x256xf32> to vector<4x256xf32>
    %548 = arith.mulf %546, %547 : vector<4x256xf32>
    %549 = arith.addf %543, %548 : vector<4x256xf32>
    %550 = vector.extract_strided_slice %305 {offsets = [0, 17], sizes = [4, 239], strides = [1, 1]} : vector<4x256xf32> to vector<4x239xf32>
    %cst_52 = arith.constant 0.000000e+00 : f32
    %551 = vector.broadcast %cst_52 : f32 to vector<4x17xf32>
    %552 = tpu.concatenate %550, %551 in 1 : vector<4x239xf32>, vector<4x17xf32> -> vector<4x256xf32>
    %c15_i32_53 = arith.constant 15 : i32
    %553 = vector.broadcast %c15_i32_53 : i32 to vector<1x256xi32>
    %554 = arith.cmpi slt, %16, %553 : vector<1x256xi32>
    %cst_54 = arith.constant 0.000000e+00 : f32
    %555 = vector.shape_cast %554 : vector<1x256xi1> to vector<1x256xi1>
    %556 = vector.broadcast %555 : vector<1x256xi1> to vector<4x256xi1>
    %557 = vector.broadcast %cst_54 : f32 to vector<4x256xf32>
    %558 = arith.select %556, %552, %557 : vector<4x256xi1>, vector<4x256xf32>
    %559 = vector.extract_strided_slice %19 {offsets = [0, 32], sizes = [4, 1], strides = [1, 1]} : vector<4x36xf32> to vector<4x1xf32>
    %560 = vector.extract_strided_slice %558 {offsets = [0, 0], sizes = [1, 256], strides = [1, 1]} : vector<4x256xf32> to vector<1x256xf32>
    %561 = vector.broadcast %559 : vector<4x1xf32> to vector<4x256xf32>
    %562 = vector.broadcast %560 : vector<1x256xf32> to vector<4x256xf32>
    %563 = arith.mulf %561, %562 : vector<4x256xf32>
    %564 = arith.addf %549, %563 : vector<4x256xf32>
    %565 = vector.extract_strided_slice %19 {offsets = [0, 33], sizes = [4, 1], strides = [1, 1]} : vector<4x36xf32> to vector<4x1xf32>
    %566 = vector.extract_strided_slice %558 {offsets = [1, 0], sizes = [1, 256], strides = [1, 1]} : vector<4x256xf32> to vector<1x256xf32>
    %567 = vector.broadcast %565 : vector<4x1xf32> to vector<4x256xf32>
    %568 = vector.broadcast %566 : vector<1x256xf32> to vector<4x256xf32>
    %569 = arith.mulf %567, %568 : vector<4x256xf32>
    %570 = arith.addf %564, %569 : vector<4x256xf32>
    %571 = vector.extract_strided_slice %19 {offsets = [0, 34], sizes = [4, 1], strides = [1, 1]} : vector<4x36xf32> to vector<4x1xf32>
    %572 = vector.extract_strided_slice %558 {offsets = [2, 0], sizes = [1, 256], strides = [1, 1]} : vector<4x256xf32> to vector<1x256xf32>
    %573 = vector.broadcast %571 : vector<4x1xf32> to vector<4x256xf32>
    %574 = vector.broadcast %572 : vector<1x256xf32> to vector<4x256xf32>
    %575 = arith.mulf %573, %574 : vector<4x256xf32>
    %576 = arith.addf %570, %575 : vector<4x256xf32>
    %577 = vector.extract_strided_slice %19 {offsets = [0, 35], sizes = [4, 1], strides = [1, 1]} : vector<4x36xf32> to vector<4x1xf32>
    %578 = vector.extract_strided_slice %558 {offsets = [3, 0], sizes = [1, 256], strides = [1, 1]} : vector<4x256xf32> to vector<1x256xf32>
    %579 = vector.broadcast %577 : vector<4x1xf32> to vector<4x256xf32>
    %580 = vector.broadcast %578 : vector<1x256xf32> to vector<4x256xf32>
    %581 = arith.mulf %579, %580 : vector<4x256xf32>
    %582 = arith.addf %576, %581 : vector<4x256xf32>
    %583 = vector.broadcast %20 : vector<4x1xf32> to vector<4x256xf32>
    %584 = arith.addf %582, %583 : vector<4x256xf32>
    %585 = arith.addf %584, %22 : vector<4x256xf32>
    %c0_55 = arith.constant 0 : index
    %c0_56 = arith.constant 0 : index
    %c0_57 = arith.constant 0 : index
    %586 = vector.load %arg6[%c0_55, %c0_56, %c0_57] : memref<1x4x256xf32, #tpu.memory_space<vmem>>, vector<1x4x256xf32>
    %587 = vector.shape_cast %586 : vector<1x4x256xf32> to vector<4x256xf32>
    %588 = vector.shape_cast %585 : vector<4x256xf32> to vector<1x4x256xf32>
    tpu.vector_store %arg6[%c0_55, %c0_56, %c0_57], %588 {strides = array<i32>} : memref<1x4x256xf32, #tpu.memory_space<vmem>>, vector<1x4x256xf32>,
    return
  }
  func.func @transform_0(%arg0: i32) -> (i32, i32, i32) {
    %c0_i32 = arith.constant 0 : i32
    %c0_i32_0 = arith.constant 0 : i32
    %c0_i32_1 = arith.constant 0 : i32
    return %arg0, %c0_i32, %c0_i32_0 : i32, i32, i32
  }
  func.func @transform_1(%arg0: i32) -> (i32, i32) {
    %c0_i32 = arith.constant 0 : i32
    %c0_i32_0 = arith.constant 0 : i32
    %c0_i32_1 = arith.constant 0 : i32
    return %c0_i32, %c0_i32_0 : i32, i32
  }
  func.func @transform_2(%arg0: i32) -> (i32, i32) {
    %c0_i32 = arith.constant 0 : i32
    %c0_i32_0 = arith.constant 0 : i32
    %c0_i32_1 = arith.constant 0 : i32
    return %c0_i32, %c0_i32_0 : i32, i32
  }
  func.func @transform_3(%arg0: i32) -> (i32, i32) {
    %c0_i32 = arith.constant 0 : i32
    %c0_i32_0 = arith.constant 0 : i32
    %c0_i32_1 = arith.constant 0 : i32
    return %c0_i32, %c0_i32_0 : i32, i32
  }
  func.func @transform_4(%arg0: i32) -> (i32, i32) {
    %c0_i32 = arith.constant 0 : i32
    %c0_i32_0 = arith.constant 0 : i32
    %c0_i32_1 = arith.constant 0 : i32
    return %c0_i32, %c0_i32_0 : i32, i32
  }
  func.func @transform_5(%arg0: i32) -> (i32, i32, i32) {
    %c0_i32 = arith.constant 0 : i32
    %c0_i32_0 = arith.constant 0 : i32
    %c0_i32_1 = arith.constant 0 : i32
    return %arg0, %c0_i32, %c0_i32_0 : i32, i32, i32
  }
}

</mosaic_0001>

<bundles_post_ra>
// kernel: residual_block_nchw.1
= control target key start
LH: loop header
LB: loop body
LE: loop exit
PB: predicated region body
PF: predicated region fallthrough
CT: control target
= control target key end

     0   :  { %s1933_s18 = smov 0   ;;  %s2599_s0 = inlined_call_operand.vmem [shape: f32[2,4,256], index: 0, kind: input, shape index: {}]   ;;  %s2600_s1 = inlined_call_operand.vmem [shape: f32[4,36], index: 1, kind: input, shape index: {}]   ;;  %s2601_s2 = inlined_call_operand.vmem [shape: f32[4,1], index: 2, kind: input, shape index: {}]   ;;  %s2602_s3 = inlined_call_operand.vmem [shape: f32[4,36], index: 3, kind: input, shape index: {}]   ;;  %s2603_s4 = inlined_call_operand.vmem [shape: f32[4,1], index: 4, kind: input, shape index: {}]   ;;  %s2604_s5 = inlined_call_operand.vmem [shape: f32[2,4,256], index: 5, kind: output, shape index: {}]  }
   0x1 LB: > { %s1709_s19 = sadd.s32 4294967295, %s1857_s18   ;;  %p1713_p0 = scmp.ge.s32.totalorder %s1857_s18, 1  ;;  %s1857_s18 = sphi %s1933_s18, %s15_s18  }
   0x2   : > { %p187_p1 = scmp.lt.s32.totalorder %s1857_s18, 3 }
   0x4   : > { %p188_p2 = pnand %p1713_p0, %p187_p1 }
   0x5   : > { %v1944_v0 = vld [vmem:[%s2600_s1] sm:$0xf] (!%p188_p2)  ;;  %p215_p3 = scmp.lt.s32.totalorder (!%p188_p2), %s1709_s19, 1  ;;  %v1859_v1 = vmov (!%p188_p2), 0   ;;  %v1860_v2 = vmov (!%p188_p2), 2   ;;  %v1861_v3 = vmov (!%p188_p2), 1   ;;  %v225_v43 = vlaneseq (!%p188_p2) }
   0x6   : > { %191 = sbr.rel (%p188_p2) target bundleno = 517 (0x205), region = 40  ;;  %1774 = vset.pattern.permute.xlu1 (!%p188_p2), %v1859_v1  ;;  %1776 = vset.pattern.permute.xlu0 (!%p188_p2), %v1860_v2  ;;  %s1862_s26 = smov (!%p188_p2), 17   ;;  %v1863_v7 = vmov (!%p188_p2), 3   ;;  %v1865_v8 = vmov (!%p188_p2), 4   ;;  %v1866_v9 = vmov (!%p188_p2), 5   ;;  %v1867_v10 = vmov (!%p188_p2), 6  }
   0x7   : > { %279 = vperm.xlu1 (!%p188_p2), %1774, %v1944_v0   ;;  %s1864_s27 = smov (!%p188_p2), 16   ;;  %v1868_v11 = vmov (!%p188_p2), 7   ;;  %s1869_s28 = smov (!%p188_p2), 15   ;;  %v1870_v12 = vmov (!%p188_p2), 8   ;;  %v1871_v13 = vmov (!%p188_p2), 9   ;;  %v1872_v14 = vmov (!%p188_p2), 11  }
   0x8   : > { %v1873_v15 = vmov (!%p188_p2), 10   ;;  %v1874_v16 = vmov (!%p188_p2), 12   ;;  %s1875_s29 = smov (!%p188_p2), 1   ;;  %v1876_v17 = vmov (!%p188_p2), 15   ;;  %v1877_v18 = vmov (!%p188_p2), 13   ;;  %s1879_s30 = smov (!%p188_p2), 127  }
   0x9   : > { %v1878_v19 = vmov (!%p188_p2), 18   ;;  %v1880_v20 = vmov (!%p188_p2), 21   ;;  %v1881_v21 = vmov (!%p188_p2), 14   ;;  %v1882_v22 = vmov (!%p188_p2), 16   ;;  %s1883_s6 = smov (!%p188_p2), 113   ;;  %s1888_s7 = smov (!%p188_p2), 112  }
   0xa   : > { %v1884_v23 = vmov (!%p188_p2), 24   ;;  %v1885_v24 = vmov (!%p188_p2), 17   ;;  %v1886_v25 = vmov (!%p188_p2), 27   ;;  %v1887_v26 = vmov (!%p188_p2), 19   ;;  %v2047_v33 = vld [vmem:[%s2602_s3] sm:$0xf] (!%p188_p2) }
   0xb   : > { %1775 = vset.pattern.permute.xlu1 (!%p188_p2), %v1861_v3  ;;  %v1889_v27 = vmov (!%p188_p2), 30   ;;  %v1890_v28 = vmov (!%p188_p2), 20   ;;  %v1891_v29 = vmov (!%p188_p2), 33   ;;  %v1892_v30 = vmov (!%p188_p2), 22   ;;  %s1901_s10 = smov (!%p188_p2), 111  }
   0xc   : > { %295 = vperm.xlu1 (!%p188_p2), %1775, %v1944_v0   ;;  %v1893_v31 = vmov (!%p188_p2), 34   ;;  %v1894_v32 = vmov (!%p188_p2), 23   ;;  %v1895_v34 = vmov (!%p188_p2), 25   ;;  %v1896_v35 = vmov (!%p188_p2), 26   ;;  %v253_v48 = vld [vmem:[%s2601_s2] sm:$0xf] (!%p188_p2) }
   0xd   : > { %s2620_s19 = smov (!%p215_p3, %s1709_s19), 1  ;;  %v1897_v36 = vmov 28   ;;  %v1898_v37 = vmov 29   ;;  %v2607_v38 = vmov 31   ;;  %v2606_v39 = vmov 32  }
   0xe   : > { %s1720_s22 = sshll.u32 %s2620_s19, 3  ;;  %v2605_v42 = vmov 35   ;;  %v2090_v45 = vand.u32 127, %v225_v43  ;;  %v2104_v53 = vshrl.u32 %v225_v43, 7  ;;  %vm264_vm0 = vcmask 138240  }
   0xf   : > { %s1957_s25 = scalar_lea.vmem %s2599_s0, %s1720_s22  ;;  %vm346_vm3 = vcmask 130048   ;;  %vm419_vm4 = vcmask 121856   ;;  %vm500_vm7 = vcmask 7168   ;;  %vm679_vm8 = vcmask 1039360   ;;  %s224_s17 = scalar_lea.vmem %s2604_s5, %s1720_s22 }
  0x10   : > { %v256_v4 = vld [vmem:[%s1957_s25] sm:$0xff]  ;;  %1777 = vset.pattern.permute.xlu1 %v1863_v7  ;;  %v2097_v49 = vadd.s32 128, %v2090_v45  ;;  %v2117_v57 = vsub.s32 1, %v2104_v53  ;;  %v232_v59 = vand.u32 15, %v2090_v45  ;;  %v2121_v60 = vsub.s32 2, %v2104_v53 }
  0x11   : > { %v1962_v5 = vmax.f32 %v256_v4, 0.0  ;;  %327 = vperm.xlu1 %1777, %v1944_v0   ;;  %v2128_v62 = vsub.s32 0, %v2104_v53  ;;  %vm754_vm9 = vcmask 924672   ;;  %vm829_vm10 = vcmask 916480  }
  0x12   : > { %v239_v51 = vand.u32 15, %v2097_v49  ;;  %vm2135_vm2 = vcmp.ge.s32.totalorder %v232_v59, 1  ;;  %vm2191_vm6 = vcmp.lt.s32.totalorder %v232_v59, 15  ;;  %vm902_vm11 = vcmask 908288  }
  0x13   : > { %260 = vrot.lane.b32.xlu0 %v1962_v5, %s1862_s26  ;;  %v1968_v6 = vcombine.high %v1962_v5, %v1962_v5 }
  0x14   : > { %vm2111_vm1 = vcmp.ge.s32.totalorder %v239_v51, 1  ;;  %vm2173_vm5 = vcmp.lt.s32.totalorder %v239_v51, 15 }
  0x15   : > { %342 = vrot.lane.b32.xlu1 %v1962_v5, %s1864_s27 }
  0x16   : > { %1778 = vset.pattern.permute.xlu1 %v1865_v8 }
  0x17   : > { %262 = vrot.lane.b32.xlu0 %v1968_v6, %s1862_s26 }
  0x19   : > { %352 = vperm.xlu1 %1778, %v1944_v0  }
  0x1b   : > { %311 = vperm.xlu0 %1776, %v1944_v0  }
  0x1d   : > { %1780 = vset.pattern.permute.xlu1 %v1867_v10 }
  0x1e   : > { %384 = vperm.xlu1 %1780, %v1944_v0  }
  0x1f   : > { %344 = vrot.lane.b32.xlu0 %v1968_v6, %s1864_s27 }
  0x20   : > { %1779 = vset.pattern.permute.xlu0 %v1866_v9 }
  0x22   : > { %1781 = vset.pattern.permute.xlu1 %v1868_v11 }
  0x23   : > { %368 = vperm.xlu0 %1779, %v1944_v0   ;;  %400 = vperm.xlu1 %1781, %v1944_v0  }
  0x27   : > { %415 = vrot.lane.b32.xlu0 %v1962_v5, %s1869_s28  ;;  %417 = vrot.lane.b32.xlu1 %v1968_v6, %s1869_s28 }
  0x28   : > { %1782 = vset.pattern.permute.xlu0 %v1870_v12  ;;  %1783 = vset.pattern.permute.xlu1 %v1871_v13 }
  0x2b   : > { %433 = vperm.xlu0 %1782, %v1944_v0   ;;  %449 = vperm.xlu1 %1783, %v1944_v0  }
  0x2f   : > { %1785 = vset.pattern.permute.xlu0 %v1872_v14  ;;  %1784 = vset.pattern.permute.xlu1 %v1873_v15 }
  0x30   : > { %481 = vperm.xlu0 %1785, %v1944_v0   ;;  %465 = vperm.xlu1 %1784, %v1944_v0  }
  0x34   : > { %1786 = vset.pattern.permute.xlu0 %v1874_v16  ;;  %496 = vrot.lane.b32.xlu1 %v1962_v5, %s1875_s29 }
  0x35   : > { %508 = vperm.xlu0 %1786, %v1944_v0   ;;  %1787 = vset.pattern.permute.xlu1 %v1877_v18 }
  0x38   : > { %498 = vrot.lane.b32.xlu1 %v1968_v6, %s1875_s29 }
  0x39   : > { %1789 = vset.pattern.permute.xlu0 %v1876_v17 }
  0x3a   : > { %556 = vperm.xlu0 %1789, %v1944_v0  }
  0x3c   : > { %524 = vperm.xlu1 %1787, %v1944_v0  }
  0x3e   : > { %1792 = vset.pattern.permute.xlu0 %v1878_v19 }
  0x3f   : > { %624 = vperm.xlu0 %1792, %v1944_v0  }
  0x40   : > { %1788 = vset.pattern.permute.xlu1 %v1881_v21 }
  0x41   : > { %540 = vperm.xlu1 %1788, %v1944_v0  }
  0x43   : > { %677 = vrot.lane.b32.xlu0 %v1968_v6, %s1879_s30 }
  0x44   : > { %1795 = vset.pattern.permute.xlu0 %v1880_v20 }
  0x45   : > { %1790 = vset.pattern.permute.xlu1 %v1882_v22 }
  0x46   : > { %572 = vperm.xlu1 %1790, %v1944_v0  }
  0x47   : > { %703 = vperm.xlu0 %1795, %v1944_v0  }
  0x4a   : > { %1791 = vset.pattern.permute.xlu1 %v1885_v24 }
  0x4b   : > { %750 = vrot.lane.b32.xlu0 %v1962_v5, %s1883_s6  ;;  %598 = vperm.xlu1 %1791, %v1944_v0  }
  0x4c   : > { %1798 = vset.pattern.permute.xlu0 %v1884_v23 }
  0x4f   : > { %762 = vperm.xlu0 %1798, %v1944_v0   ;;  %1793 = vset.pattern.permute.xlu1 %v1887_v26 }
  0x50   : > { %650 = vperm.xlu1 %1793, %v1944_v0  }
  0x53   : > { %1801 = vset.pattern.permute.xlu0 %v1886_v25 }
  0x54   : > { %810 = vperm.xlu0 %1801, %v1944_v0   ;;  %675 = vrot.lane.b32.xlu1 %v1962_v5, %s1879_s30 }
  0x55   : > { %1794 = vset.pattern.permute.xlu1 %v1890_v28 }
  0x58   : > { %825 = vrot.lane.b32.xlu0 %v1962_v5, %s1888_s7  ;;  %687 = vperm.xlu1 %1794, %v1944_v0  }
  0x59   : > { %1804 = vset.pattern.permute.xlu0 %v1889_v27 }
  0x5c   : > { %867 = vperm.xlu0 %1804, %v1944_v0   ;;  %1796 = vset.pattern.permute.xlu1 %v1892_v30 }
  0x5d   : > { %719 = vperm.xlu1 %1796, %v1944_v0  }
  0x60   : > { %1807 = vset.pattern.permute.xlu0 %v1891_v29 }
  0x61   : > { %926 = vperm.xlu0 %1807, %v1944_v0   ;;  %1797 = vset.pattern.permute.xlu1 %v1894_v32 }
  0x62   : > { %735 = vperm.xlu1 %1797, %v1944_v0  }
  0x65   : > { %1808 = vset.pattern.permute.xlu0 %v1893_v31 }
  0x66   : > { %942 = vperm.xlu0 %1808, %v1944_v0   ;;  %752 = vrot.lane.b32.xlu1 %v1968_v6, %s1883_s6 }
  0x67   : > { %1799 = vset.pattern.permute.xlu1 %v1895_v34 }
  0x6a   : > { %1811 = vset.pattern.permute.xlu0 %v1859_v1  ;;  %778 = vperm.xlu1 %1799, %v1944_v0  }
  0x6b   : > { %996 = vperm.xlu0 %1811, %v2047_v33  }
  0x6e   : > { %1800 = vset.pattern.permute.xlu1 %v1896_v35 }
  0x6f   : > { %1814 = vset.pattern.permute.xlu0 %v1863_v7  ;;  %794 = vperm.xlu1 %1800, %v1944_v0  }
  0x70   : > { %1044 = vperm.xlu0 %1814, %v2047_v33  }
  0x73   : > { %1802 = vset.pattern.permute.xlu1 %v1897_v36 }
  0x74   : > { %1815 = vset.pattern.permute.xlu0 %v1865_v8  ;;  %835 = vperm.xlu1 %1802, %v1944_v0  }
  0x75   : > { %1068 = vperm.xlu0 %1815, %v2047_v33  }
  0x78   : > { %1803 = vset.pattern.permute.xlu1 %v1898_v37 }
  0x79   : > { %1818 = vset.pattern.permute.xlu0 %v1868_v11  ;;  %851 = vperm.xlu1 %1803, %v1944_v0  }
  0x7a   : > { %1116 = vperm.xlu0 %1818, %v2047_v33  }
  0x7d   : > { %827 = vrot.lane.b32.xlu1 %v1968_v6, %s1888_s7 }
  0x7e   : > { %1819 = vset.pattern.permute.xlu0 %v1870_v12  ;;  %1805 = vset.pattern.permute.xlu1 %v2607_v38  ;;  %v2146_v12 = vsub.s32 3, %v2104_v53 }
  0x7f   : > { %1142 = vperm.xlu0 %1819, %v2047_v33  }
  0x81   : > { %883 = vperm.xlu1 %1805, %v1944_v0  }
  0x83   : > { %1822 = vset.pattern.permute.xlu0 %v1872_v14 }
  0x84   : > { %1190 = vperm.xlu0 %1822, %v2047_v33  }
  0x85   : > { %1806 = vset.pattern.permute.xlu1 %v2606_v39  ;;  %v261_v46 = vpop.permute.xlu0 %260 }
  0x86   : > { %v2078_v40 = vpop.permute.xlu1 %279  ;;  %910 = vperm.xlu1 %1806, %v1944_v0  }
  0x88   : > { %1825 = vset.pattern.permute.xlu0 %v1881_v21 }
  0x89   : > { %1248 = vperm.xlu0 %1825, %v2047_v33   ;;  %v263_v52 = vpop.permute.xlu0 %262 }
  0x8a   : > { %898 = vrot.lane.b32.xlu1 %v1962_v5, %s1901_s10  ;;  %v265_v56 = vsel %vm264_vm0, %v261_v46, %v263_v52 }
  0x8b   : > { %v296_v41 = vpop.permute.xlu1 %295  ;;  %1809 = vset.pattern.permute.xlu1 %v2605_v42  ;;  %v276_v61 = vsel %vm2111_vm1, %v265_v56, 0.0 }
  0x8c   : > { %v305_v63 = vrot.slane %v276_v61, %v2117_v57  ;;  %v289_v4 = vrot.slane %v276_v61, %v2128_v62  ;;  %v337_v52 = vrot.slane %v276_v61, %v2146_v12 }
  0x8d   : > { %1828 = vset.pattern.permute.xlu0 %v1885_v24 }
  0x8e   : > { %1296 = vperm.xlu0 %1828, %v2047_v33   ;;  %900 = vrot.lane.b32.xlu1 %v1968_v6, %s1901_s10  ;;  %v321_v6 = vrot.slane %v276_v61, %v2121_v60  ;;  %v307_v11 = vmul.f32 %v305_v63, %v296_v41 }
  0x90   : > { %v2088_v44 = vpop.permute.xlu1 %327 }
  0x91   : > { %v339_v39 = vmul.f32 %v337_v52, %v2088_v44 }
  0x92   : > { %1831 = vset.pattern.permute.xlu0 %v1890_v28  ;;  %958 = vperm.xlu1 %1809, %v1944_v0   ;;  %v291_v28 = vmul.f32 %v289_v4, %v2078_v40 }
  0x94   : > { %v343_v47 = vpop.permute.xlu1 %342 }
  0x96   : > { %1810 = vset.pattern.permute.xlu1 %v1859_v1 }
  0x97   : > { %975 = vperm.xlu1 %1810, %v253_v48   ;;  %v309_v48 = vadd.f32 %v307_v11, %v291_v28  ;;  %v350_v11 = vsel %vm346_vm3, 0.0, %v343_v47 }
  0x98   : > { %v2100_v50 = vpop.permute.xlu1 %352 }
  0x9a   : > { %v312_v58 = vpop.permute.xlu0 %311 }
  0x9b   : > { %1812 = vset.pattern.permute.xlu1 %v1861_v3  ;;  %v323_v43 = vmul.f32 %v321_v6, %v312_v58 }
  0x9c   : > { %1012 = vperm.xlu1 %1812, %v2047_v33  }
  0x9d   : > { %v2107_v54 = vpop.permute.xlu1 %384 }
  0x9e   : > { %v345_v7 = vpop.permute.xlu0 %344 }
  0x9f   : > { %v347_v24 = vsel %vm346_vm3, %v343_v47, %v345_v7  ;;  %v325_v7 = vadd.f32 %v323_v43, %v309_v48 }
  0xa0   : > { %1813 = vset.pattern.permute.xlu1 %v1860_v2  ;;  %v268_v2 = vsel %vm264_vm0, 0.0, %v261_v46  ;;  %v362_v56 = vrot.slane %v347_v24, %v2128_v62  ;;  %v378_v28 = vrot.slane %v347_v24, %v2117_v57  ;;  %v394_v48 = vrot.slane %v347_v24, %v2121_v60 }
  0xa1   : > { %1028 = vperm.xlu1 %1813, %v2047_v33   ;;  %v275_v8 = vsel %vm2135_vm2, %v268_v2, 0.0 }
  0xa2   : > { %v2131_v0 = vpop.permute.xlu1 %400  ;;  %v301_v21 = vrot.slane %v275_v8, %v2117_v57  ;;  %v317_v46 = vrot.slane %v275_v8, %v2121_v60  ;;  %v369_v42 = vpop.permute.xlu0 %368  ;;  %v364_v61 = vmul.f32 %v362_v56, %v2100_v50  ;;  %v374_v56 = vrot.slane %v350_v11, %v2117_v57 }
  0xa4   : > { %v306_v2 = vmul.f32 %v301_v21, %v296_v41  ;;  %v322_v6 = vmul.f32 %v317_v46, %v312_v58  ;;  %v341_v21 = vadd.f32 %v339_v39, %v325_v7  ;;  %v358_v58 = vrot.slane %v350_v11, %v2128_v62 }
  0xa5   : > { %1816 = vset.pattern.permute.xlu1 %v1866_v9  ;;  %v285_v9 = vrot.slane %v275_v8, %v2128_v62  ;;  %v410_v7 = vrot.slane %v347_v24, %v2146_v12  ;;  %v390_v24 = vrot.slane %v350_v11, %v2121_v60 }
  0xa6   : > { %1084 = vperm.xlu1 %1816, %v2047_v33   ;;  %v418_v14 = vpop.permute.xlu1 %417  ;;  %v416_v43 = vpop.permute.xlu0 %415  ;;  %v366_v47 = vadd.f32 %v364_v61, %v341_v21  ;;  %v363_v52 = vmul.f32 %v358_v58, %v2100_v50  ;;  %v406_v58 = vrot.slane %v350_v11, %v2146_v12 }
  0xa7   : > { %v290_v4 = vmul.f32 %v285_v9, %v2078_v40  ;;  %v380_v9 = vmul.f32 %v378_v28, %v369_v42 }
  0xa9   : > { %v308_v38 = vadd.f32 %v306_v2, %v290_v4  ;;  %v382_v51 = vadd.f32 %v380_v9, %v366_v47  ;;  %v379_v2 = vmul.f32 %v374_v56, %v369_v42  ;;  %v412_v42 = vmul.f32 %v410_v7, %v2131_v0 }
  0xaa   : > { %1817 = vset.pattern.permute.xlu1 %v1867_v10  ;;  %v2157_v63 = vpop.permute.xlu1 %449  ;;  %v333_v10 = vrot.slane %v275_v8, %v2146_v12  ;;  %v411_v9 = vmul.f32 %v406_v58, %v2131_v0 }
  0xab   : > { %1100 = vperm.xlu1 %1817, %v2047_v33   ;;  %v324_v40 = vadd.f32 %v322_v6, %v308_v38  ;;  %v423_v6 = vsel %vm419_vm4, 0.0, %v416_v43 }
  0xac   : > { %v338_v8 = vmul.f32 %v333_v10, %v2088_v44  ;;  %v396_v44 = vmul.f32 %v394_v48, %v2107_v54  ;;  %v434_v10 = vpop.permute.xlu0 %433  ;;  %v430_v45 = vsel %vm2191_vm6, %v423_v6, 0.0 }
  0xae   : > { %v340_v38 = vadd.f32 %v338_v8, %v324_v40  ;;  %v398_v61 = vadd.f32 %v396_v44, %v382_v51  ;;  %v395_v40 = vmul.f32 %v390_v24, %v2107_v54  ;;  %v455_v54 = vrot.slane %v430_v45, %v2117_v57 }
  0xaf   : > { %1820 = vset.pattern.permute.xlu1 %v1871_v13  ;;  %v2167_v41 = vpop.permute.xlu1 %465  ;;  %v420_v13 = vsel %vm419_vm4, %v416_v43, %v418_v14  ;;  %v471_v51 = vrot.slane %v430_v45, %v2121_v60 }
  0xb0   : > { %1158 = vperm.xlu1 %1820, %v2047_v33   ;;  %v431_v49 = vsel %vm2173_vm5, %v420_v13, 0.0  ;;  %v414_v43 = vadd.f32 %v412_v42, %v398_v61  ;;  %v439_v13 = vrot.slane %v430_v45, %v2128_v62  ;;  %v460_v7 = vmul.f32 %v455_v54, %v2157_v63 }
  0xb1   : > { %v443_v4 = vrot.slane %v431_v49, %v2128_v62  ;;  %v491_v6 = vrot.slane %v431_v49, %v2146_v12  ;;  %v476_v24 = vmul.f32 %v471_v51, %v2167_v41 }
  0xb3   : > { %v497_v39 = vpop.permute.xlu1 %496  ;;  %v445_v59 = vmul.f32 %v443_v4, %v434_v10  ;;  %v482_v4 = vpop.permute.xlu0 %481 }
  0xb4   : > { %1821 = vset.pattern.permute.xlu1 %v1873_v15  ;;  %v365_v15 = vadd.f32 %v363_v52, %v340_v38  ;;  %v475_v52 = vrot.slane %v431_v49, %v2121_v60  ;;  %v504_v44 = vsel %vm500_vm7, 0.0, %v497_v39 }
  0xb5   : > { %1174 = vperm.xlu1 %1821, %v2047_v33   ;;  %v447_v8 = vadd.f32 %v445_v59, %v414_v43  ;;  %v493_v59 = vmul.f32 %v491_v6, %v482_v4  ;;  %v633_v6 = vsub.s32 6, %v2104_v53 }
  0xb6   : > { %v381_v28 = vadd.f32 %v379_v2, %v365_v15 }
  0xb7   : > { %v499_v14 = vpop.permute.xlu1 %498 }
  0xb8   : > { %v397_v47 = vadd.f32 %v395_v40, %v381_v28  ;;  %v501_v48 = vsel %vm500_vm7, %v497_v39, %v499_v14  ;;  %v477_v14 = vmul.f32 %v475_v52, %v2167_v41  ;;  %v505_v39 = vsel %vm2135_vm2, %v504_v44, 0.0 }
  0xb9   : > { %1823 = vset.pattern.permute.xlu1 %v1874_v16  ;;  %v459_v16 = vrot.slane %v431_v49, %v2117_v57  ;;  %v2216_v0 = vsel %vm2111_vm1, %v501_v48, 0.0  ;;  %v514_v49 = vrot.slane %v505_v39, %v2128_v62  ;;  %v607_v48 = vsub.s32 5, %v2104_v53 }
  0xba   : > { %1216 = vperm.xlu1 %1823, %v2047_v33   ;;  %v413_v56 = vadd.f32 %v411_v9, %v397_v47  ;;  %v518_v61 = vrot.slane %v2216_v0, %v2128_v62  ;;  %v534_v41 = vrot.slane %v2216_v0, %v2117_v57  ;;  %v581_v47 = vsub.s32 4, %v2104_v53 }
  0xbb   : > { %v525_v21 = vpop.permute.xlu1 %524  ;;  %v461_v11 = vmul.f32 %v459_v16, %v2157_v63  ;;  %v530_v9 = vrot.slane %v505_v39, %v2117_v57 }
  0xbc   : > { %v536_v52 = vmul.f32 %v534_v41, %v525_v21 }
  0xbd   : > { %v463_v2 = vadd.f32 %v461_v11, %v447_v8  ;;  %v535_v11 = vmul.f32 %v530_v9, %v525_v21  ;;  %v604_v21 = vrot.slane %v1962_v5, %v2117_v57 }
  0xbe   : > { %1824 = vset.pattern.permute.xlu1 %v1877_v18  ;;  %v444_v18 = vmul.f32 %v439_v13, %v434_v10  ;;  %v509_v10 = vpop.permute.xlu0 %508 }
  0xbf   : > { %1232 = vperm.xlu1 %1824, %v2047_v33   ;;  %v479_v28 = vadd.f32 %v477_v14, %v463_v2  ;;  %v520_v40 = vmul.f32 %v518_v61, %v509_v10  ;;  %v582_v2 = vrot.slane %v1962_v5, %v581_v47 }
  0xc0   : > { %v541_v38 = vpop.permute.xlu1 %540  ;;  %v446_v42 = vadd.f32 %v444_v18, %v413_v56  ;;  %v546_v56 = vrot.slane %v505_v39, %v2121_v60  ;;  %v550_v18 = vrot.slane %v2216_v0, %v2121_v60 }
  0xc2   : > { %v462_v63 = vadd.f32 %v460_v7, %v446_v42  ;;  %v557_v51 = vpop.permute.xlu0 %556  ;;  %v551_v7 = vmul.f32 %v546_v56, %v541_v38  ;;  %v562_v42 = vrot.slane %v505_v39, %v2146_v12  ;;  %v659_v39 = vsub.s32 7, %v2104_v53 }
  0xc3   : > { %1826 = vset.pattern.permute.xlu1 %v1876_v17  ;;  %v487_v17 = vrot.slane %v430_v45, %v2146_v12  ;;  %v495_v45 = vadd.f32 %v493_v59, %v479_v28  ;;  %v608_v28 = vrot.slane %v1962_v5, %v607_v48  ;;  %v592_v59 = vrot.slane %v582_v2, %v2128_v62 }
  0xc4   : > { %1264 = vperm.xlu1 %1826, %v2047_v33   ;;  %v478_v16 = vadd.f32 %v476_v24, %v462_v63 }
  0xc5   : > { %v2223_v15 = vpop.permute.xlu1 %572  ;;  %v492_v43 = vmul.f32 %v487_v17, %v482_v4  ;;  %v522_v13 = vadd.f32 %v520_v40, %v495_v45  ;;  %v552_v4 = vmul.f32 %v550_v18, %v541_v38  ;;  %v566_v17 = vrot.slane %v2216_v0, %v2146_v12 }
  0xc6   : > { %v625_v63 = vpop.permute.xlu0 %624  ;;  %v634_v40 = vrot.slane %v1962_v5, %v633_v6  ;;  %v567_v0 = vmul.f32 %v562_v42, %v557_v51  ;;  %v614_v45 = vrot.slane %v604_v21, %v2117_v57  ;;  %v618_v41 = vrot.slane %v608_v28, %v2117_v57 }
  0xc7   : > { %v494_v8 = vadd.f32 %v492_v43, %v478_v16  ;;  %v538_v44 = vadd.f32 %v536_v52, %v522_v13  ;;  %v568_v16 = vmul.f32 %v566_v17, %v557_v51 }
  0xc8   : > { %1827 = vset.pattern.permute.xlu1 %v1882_v22  ;;  %v519_v22 = vmul.f32 %v514_v49, %v509_v10  ;;  %v630_v49 = vrot.slane %v1962_v5, %v2121_v60  ;;  %v644_v53 = vrot.slane %v634_v40, %v2121_v60 }
  0xc9   : > { %1280 = vperm.xlu1 %1827, %v2047_v33   ;;  %v554_v10 = vadd.f32 %v552_v4, %v538_v44 }
  0xca   : > { %v599_v58 = vpop.permute.xlu1 %598  ;;  %v521_v14 = vadd.f32 %v519_v22, %v494_v8  ;;  %v678_v47 = vpop.permute.xlu0 %677  ;;  %v594_v8 = vmul.f32 %v592_v59, %v2223_v15  ;;  %v640_v48 = vrot.slane %v630_v49, %v2121_v60  ;;  %v646_v6 = vmul.f32 %v644_v53, %v625_v63 }
  0xcb   : > { %v570_v9 = vadd.f32 %v568_v16, %v554_v10  ;;  %v619_v52 = vmul.f32 %v614_v45, %v599_v58  ;;  %v620_v56 = vmul.f32 %v618_v41, %v599_v58  ;;  %v683_v51 = vsel %vm679_vm8, %v678_v47, 0.0 }
  0xcc   : > { %v537_v24 = vadd.f32 %v535_v11, %v521_v14  ;;  %v660_v11 = vrot.slane %v1962_v5, %v659_v39  ;;  %v685_v4 = vsel %vm2173_vm5, %v683_v51, 0.0  ;;  %v645_v58 = vmul.f32 %v640_v48, %v625_v63 }
  0xcd   : > { %1829 = vset.pattern.permute.xlu1 %v1878_v19  ;;  %v578_v19 = vrot.slane %v1962_v5, %v2128_v62  ;;  %v596_v14 = vadd.f32 %v594_v8, %v570_v9  ;;  %v697_v17 = vrot.slane %v685_v4, %v2128_v62  ;;  %v713_v39 = vrot.slane %v685_v4, %v2117_v57 }
  0xce   : > { %1312 = vperm.xlu1 %1829, %v2047_v33   ;;  %v553_v38 = vadd.f32 %v551_v7, %v537_v24  ;;  %v670_v44 = vrot.slane %v660_v11, %v2146_v12  ;;  %v729_v8 = vrot.slane %v685_v4, %v2121_v60  ;;  %v745_v11 = vrot.slane %v685_v4, %v2146_v12 }
  0xcf   : > { %v2242_v54 = vpop.permute.xlu1 %650  ;;  %v622_v21 = vadd.f32 %v620_v56, %v596_v14 }
  0xd0   : > { %v569_v22 = vadd.f32 %v567_v0, %v553_v38  ;;  %v672_v10 = vmul.f32 %v670_v44, %v2242_v54 }
  0xd1   : > { %v648_v28 = vadd.f32 %v646_v6, %v622_v21 }
  0xd2   : > { %1830 = vset.pattern.permute.xlu1 %v1887_v26  ;;  %v588_v26 = vrot.slane %v578_v19, %v2128_v62 }
  0xd3   : > { %1328 = vperm.xlu1 %1830, %v2047_v33   ;;  %v676_v61 = vpop.permute.xlu1 %675  ;;  %v674_v63 = vadd.f32 %v672_v10, %v648_v28 }
  0xd4   : > { %v593_v13 = vmul.f32 %v588_v26, %v2223_v15  ;;  %v680_v18 = vsel %vm679_vm8, %v676_v61, %v678_v47  ;;  %v704_v26 = vpop.permute.xlu0 %703 }
  0xd5   : > { %v684_v7 = vsel %vm2191_vm6, %v680_v18, 0.0 }
  0xd6   : > { %v595_v2 = vadd.f32 %v593_v13, %v569_v22  ;;  %v693_v42 = vrot.slane %v684_v7, %v2128_v62  ;;  %v709_v16 = vrot.slane %v684_v7, %v2117_v57  ;;  %v741_v18 = vrot.slane %v684_v7, %v2146_v12 }
  0xd7   : > { %v688_v43 = vpop.permute.xlu1 %687  ;;  %1832 = vset.pattern.permute.xlu1 %v1880_v20  ;;  %v656_v20 = vrot.slane %v1962_v5, %v2146_v12 }
  0xd8   : > { %v621_v5 = vadd.f32 %v619_v52, %v595_v2  ;;  %v698_v49 = vmul.f32 %v693_v42, %v688_v43  ;;  %v699_v40 = vmul.f32 %v697_v17, %v688_v43  ;;  %v751_v45 = vpop.permute.xlu0 %750  ;;  %v714_v48 = vmul.f32 %v709_v16, %v704_v26 }
  0xd9   : > { %v666_v15 = vrot.slane %v656_v20, %v2146_v12  ;;  %v725_v20 = vrot.slane %v684_v7, %v2121_v60 }
  0xda   : > { %v647_v24 = vadd.f32 %v645_v58, %v621_v5  ;;  %v701_v13 = vadd.f32 %v699_v40, %v674_v63 }
  0xdb   : > { %v671_v38 = vmul.f32 %v666_v15, %v2242_v54  ;;  %v715_v54 = vmul.f32 %v713_v39, %v704_v26 }
  0xdc   : > { %v720_v19 = vpop.permute.xlu1 %719  ;;  %v763_v58 = vpop.permute.xlu0 %762 }
  0xdd   : > { %v673_v0 = vadd.f32 %v671_v38, %v647_v24  ;;  %v717_v56 = vadd.f32 %v715_v54, %v701_v13  ;;  %v730_v2 = vmul.f32 %v725_v20, %v720_v19  ;;  %v731_v14 = vmul.f32 %v729_v8, %v720_v19 }
  0xdf   : > { %v700_v9 = vadd.f32 %v698_v49, %v673_v0  ;;  %v733_v42 = vadd.f32 %v731_v14, %v717_v56 }
  0xe1   : > { %v736_v61 = vpop.permute.xlu1 %735  ;;  %v716_v52 = vadd.f32 %v714_v48, %v700_v9 }
  0xe2   : > { %v746_v5 = vmul.f32 %v741_v18, %v736_v61  ;;  %v747_v21 = vmul.f32 %v745_v11, %v736_v61 }
  0xe3   : > { %v732_v6 = vadd.f32 %v730_v2, %v716_v52 }
  0xe4   : > { %v749_v38 = vadd.f32 %v747_v21, %v733_v42 }
  0xe5   : > { %v753_v59 = vpop.permute.xlu1 %752  ;;  %v748_v4 = vadd.f32 %v746_v5, %v732_v6 }
  0xe6   : > { %v755_v41 = vsel %vm754_vm9, %v751_v45, %v753_v59  ;;  %v758_v47 = vsel %vm754_vm9, %v753_v59, 0.0  ;;  %v811_v59 = vpop.permute.xlu0 %810 }
  0xe7   : > { %v759_v43 = vsel %vm2135_vm2, %v755_v41, 0.0  ;;  %v760_v53 = vsel %vm2111_vm1, %v758_v47, 0.0 }
  0xe8   : > { %v768_v15 = vrot.slane %v759_v43, %v2128_v62  ;;  %v772_v44 = vrot.slane %v760_v53, %v2128_v62  ;;  %v788_v10 = vrot.slane %v760_v53, %v2117_v57  ;;  %v784_v7 = vrot.slane %v759_v43, %v2117_v57 }
  0xe9   : > { %v779_v22 = vpop.permute.xlu1 %778  ;;  %v804_v61 = vrot.slane %v760_v53, %v2121_v60  ;;  %v800_v0 = vrot.slane %v759_v43, %v2121_v60  ;;  %v816_v13 = vrot.slane %v759_v43, %v2146_v12  ;;  %v820_v54 = vrot.slane %v760_v53, %v2146_v12 }
  0xea   : > { %v773_v17 = vmul.f32 %v768_v15, %v763_v58  ;;  %v774_v24 = vmul.f32 %v772_v44, %v763_v58  ;;  %v789_v40 = vmul.f32 %v784_v7, %v779_v22  ;;  %v790_v39 = vmul.f32 %v788_v10, %v779_v22  ;;  %v826_v47 = vpop.permute.xlu0 %825 }
  0xeb   : > { %v821_v18 = vmul.f32 %v816_v13, %v811_v59  ;;  %v822_v2 = vmul.f32 %v820_v54, %v811_v59 }
  0xec   : > { %v775_v26 = vadd.f32 %v773_v17, %v748_v4  ;;  %v776_v19 = vadd.f32 %v774_v24, %v749_v38 }
  0xee   : > { %v795_v51 = vpop.permute.xlu1 %794  ;;  %v791_v63 = vadd.f32 %v789_v40, %v775_v26  ;;  %v792_v16 = vadd.f32 %v790_v39, %v776_v19  ;;  %v868_v4 = vpop.permute.xlu0 %867 }
  0xef   : > { %v805_v45 = vmul.f32 %v800_v0, %v795_v51  ;;  %v806_v41 = vmul.f32 %v804_v61, %v795_v51 }
  0xf1   : > { %v807_v11 = vadd.f32 %v805_v45, %v791_v63  ;;  %v808_v52 = vadd.f32 %v806_v41, %v792_v16 }
  0xf2   : > { %v927_v63 = vpop.permute.xlu0 %926 }
  0xf3   : > { %v836_v28 = vpop.permute.xlu1 %835  ;;  %v823_v15 = vadd.f32 %v821_v18, %v807_v11  ;;  %v824_v44 = vadd.f32 %v822_v2, %v808_v52 }
  0xf8   : > { %v852_v49 = vpop.permute.xlu1 %851 }
  0xfc   : > { %v828_v9 = vpop.permute.xlu1 %827 }
  0xfd   : > { %v830_v8 = vsel %vm829_vm10, %v826_v47, %v828_v9  ;;  %v833_v48 = vsel %vm829_vm10, %v828_v9, 0.0 }
  0xfe   : > { %v841_v22 = vrot.slane %v830_v8, %v2128_v62  ;;  %v845_v20 = vrot.slane %v833_v48, %v2128_v62  ;;  %v857_v43 = vrot.slane %v830_v8, %v2117_v57  ;;  %v861_v53 = vrot.slane %v833_v48, %v2117_v57 }
  0xff   : > { %v873_v17 = vrot.slane %v830_v8, %v2121_v60  ;;  %v877_v24 = vrot.slane %v833_v48, %v2121_v60  ;;  %v889_v59 = vrot.slane %v830_v8, %v2146_v12 }
 0x100   : > { %v884_v56 = vpop.permute.xlu1 %883  ;;  %v846_v51 = vmul.f32 %v841_v22, %v836_v28  ;;  %v847_v14 = vmul.f32 %v845_v20, %v836_v28  ;;  %v862_v6 = vmul.f32 %v857_v43, %v852_v49  ;;  %v863_v42 = vmul.f32 %v861_v53, %v852_v49  ;;  %v943_v43 = vpop.permute.xlu0 %942 }
 0x101   : > { %v893_v28 = vrot.slane %v833_v48, %v2146_v12  ;;  %v878_v26 = vmul.f32 %v873_v17, %v868_v4  ;;  %v879_v19 = vmul.f32 %v877_v24, %v868_v4  ;;  %v894_v16 = vmul.f32 %v889_v59, %v884_v56 }
 0x102   : > { %v848_v5 = vadd.f32 %v846_v51, %v823_v15  ;;  %v849_v21 = vadd.f32 %v847_v14, %v824_v44 }
 0x103   : > { %v895_v45 = vmul.f32 %v893_v28, %v884_v56 }
 0x104   : > { %v864_v38 = vadd.f32 %v862_v6, %v848_v5  ;;  %v865_v10 = vadd.f32 %v863_v42, %v849_v21 }
 0x105   : > { %v911_v58 = vpop.permute.xlu1 %910 }
 0x106   : > { %v880_v40 = vadd.f32 %v878_v26, %v864_v38  ;;  %v881_v39 = vadd.f32 %v879_v19, %v865_v10 }
 0x108   : > { %v896_v48 = vadd.f32 %v894_v16, %v880_v40  ;;  %v897_v22 = vadd.f32 %v895_v45, %v881_v39 }
 0x109   : > { %v899_v7 = vpop.permute.xlu1 %898 }
 0x10d   : > { %v901_v61 = vpop.permute.xlu1 %900 }
 0x10e   : > { %v903_v49 = vsel %vm902_vm11, %v899_v7, %v901_v61  ;;  %v906_v0 = vsel %vm902_vm11, %v901_v61, 0.0 }
 0x10f   : > { %v907_v41 = vsel %vm2191_vm6, %v903_v49, 0.0  ;;  %v908_v47 = vsel %vm2173_vm5, %v906_v0, 0.0  ;;  %v255_v0 = vld [vmem:[%s2603_s4] sm:$0xf] }
 0x110   : > { %v916_v9 = vrot.slane %v907_v41, %v2128_v62  ;;  %v920_v13 = vrot.slane %v908_v47, %v2128_v62  ;;  %v932_v54 = vrot.slane %v907_v41, %v2117_v57  ;;  %v936_v8 = vrot.slane %v908_v47, %v2117_v57 }
 0x111   : > { %v948_v52 = vrot.slane %v907_v41, %v2121_v60  ;;  %v952_v56 = vrot.slane %v908_v47, %v2121_v60  ;;  %v964_v18 = vrot.slane %v907_v41, %v2146_v12  ;;  %v968_v2 = vrot.slane %v908_v47, %v2146_v12  ;;  %v959_v53 = vpop.permute.xlu1 %958 }
 0x112   : > { %v921_v20 = vmul.f32 %v916_v9, %v911_v58  ;;  %v922_v11 = vmul.f32 %v920_v13, %v911_v58  ;;  %v937_v51 = vmul.f32 %v932_v54, %v927_v63  ;;  %v938_v14 = vmul.f32 %v936_v8, %v927_v63 }
 0x113   : > { %v953_v6 = vmul.f32 %v948_v52, %v943_v43  ;;  %v954_v42 = vmul.f32 %v952_v56, %v943_v43  ;;  %v969_v17 = vmul.f32 %v964_v18, %v959_v53  ;;  %v970_v58 = vmul.f32 %v968_v2, %v959_v53 }
 0x114   : > { %v923_v15 = vadd.f32 %v921_v20, %v896_v48  ;;  %v924_v44 = vadd.f32 %v922_v11, %v897_v22 }
 0x116   : > { %v939_v5 = vadd.f32 %v937_v51, %v923_v15  ;;  %v940_v21 = vadd.f32 %v938_v14, %v924_v44  ;;  %v976_v38 = vpop.permute.xlu1 %975 }
 0x118   : > { %v955_v24 = vadd.f32 %v953_v6, %v939_v5  ;;  %v956_v4 = vadd.f32 %v954_v42, %v940_v21 }
 0x11a   : > { %v971_v10 = vadd.f32 %v969_v17, %v955_v24  ;;  %v972_v7 = vadd.f32 %v970_v58, %v956_v4 }
 0x11c   : > { %v978_v28 = vadd.f32 %v976_v38, %v971_v10  ;;  %v979_v26 = vadd.f32 %v976_v38, %v972_v7 }
 0x11e   : > { %v2331_v19 = vmax.f32 %v978_v28, 0.0  ;;  %v2333_v59 = vmax.f32 %v979_v26, 0.0 }
 0x120   : > { %986 = vrot.lane.b32.xlu1 %v2333_v59, %s1862_s26  ;;  %984 = vrot.lane.b32.xlu0 %v2331_v19, %s1862_s26 }
 0x124   : > { %1059 = vrot.lane.b32.xlu1 %v2331_v19, %s1864_s27  ;;  %1205 = vrot.lane.b32.xlu0 %v2331_v19, %s1875_s29 }
 0x128   : > { %1061 = vrot.lane.b32.xlu1 %v2333_v59, %s1864_s27  ;;  %1354 = vperm.xlu0 %1831, %v2047_v33  }
 0x12c   : > { %1131 = vrot.lane.b32.xlu1 %v2331_v19, %s1869_s28  ;;  %1345 = vrot.lane.b32.xlu0 %v2333_v59, %s1879_s30 }
 0x12d   : > { %1834 = vset.pattern.permute.xlu0 %v1894_v32 }
 0x130   : > { %1133 = vrot.lane.b32.xlu1 %v2333_v59, %s1869_s28  ;;  %1402 = vperm.xlu0 %1834, %v2047_v33  }
 0x134   : > { %1370 = vperm.xlu1 %1832, %v2047_v33   ;;  %1417 = vrot.lane.b32.xlu0 %v2331_v19, %s1883_s6 }
 0x135   : > { %1837 = vset.pattern.permute.xlu0 %v1896_v35 }
 0x138   : > { %1207 = vrot.lane.b32.xlu1 %v2333_v59, %s1875_s29  ;;  %1460 = vperm.xlu0 %1837, %v2047_v33  }
 0x139   : > { %1833 = vset.pattern.permute.xlu1 %v1892_v30  ;;  %v1013_v30 = vpop.permute.xlu1 %1012 }
 0x13c   : > { %1343 = vrot.lane.b32.xlu1 %v2331_v19, %s1879_s30  ;;  %1840 = vset.pattern.permute.xlu0 %v1898_v37  ;;  %v2618_v37 = vmov 35  }
 0x13d   : > { %1516 = vperm.xlu0 %1840, %v2047_v33  }
 0x140   : > { %1386 = vperm.xlu1 %1833, %v2047_v33  }
 0x141   : > { %1841 = vset.pattern.permute.xlu0 %v1889_v27 }
 0x142   : > { %1532 = vperm.xlu0 %1841, %v2047_v33  }
 0x144   : > { %1835 = vset.pattern.permute.xlu1 %v1884_v23  ;;  %v1029_v23 = vpop.permute.xlu1 %1028 }
 0x145   : > { %1428 = vperm.xlu1 %1835, %v2047_v33  }
 0x146   : > { %1844 = vset.pattern.permute.xlu0 %v1891_v29  ;;  %v2616_v29 = vmov 31  }
 0x147   : > { %1590 = vperm.xlu0 %1844, %v2047_v33  }
 0x148   : > { %v2384_v27 = vpop.permute.xlu1 %1084 }
 0x149   : > { %1836 = vset.pattern.permute.xlu1 %v1895_v34  ;;  %v2617_v34 = vmov 32  }
 0x14a   : > { %1444 = vperm.xlu1 %1836, %v2047_v33  }
 0x14b   : > { %1845 = vset.pattern.permute.xlu0 %v1893_v31 }
 0x14c   : > { %1606 = vperm.xlu0 %1845, %v2047_v33   ;;  %v2389_v31 = vpop.permute.xlu1 %1100 }
 0x14e   : > { %1419 = vrot.lane.b32.xlu1 %v2333_v59, %s1883_s6 }
 0x14f   : > { %1838 = vset.pattern.permute.xlu1 %v1886_v25  ;;  %v997_v25 = vpop.permute.xlu0 %996 }
 0x150   : > { %1848 = vset.pattern.permute.xlu0 %v1859_v1  ;;  %v2394_v32 = vpop.permute.xlu1 %1158 }
 0x152   : > { %1476 = vperm.xlu1 %1838, %v2047_v33  }
 0x153   : > { %v1045_v35 = vpop.permute.xlu0 %1044 }
 0x156   : > { %1839 = vset.pattern.permute.xlu1 %v1897_v36  ;;  %v2398_v36 = vpop.permute.xlu1 %1174 }
 0x157   : > { %1500 = vperm.xlu1 %1839, %v2047_v33   ;;  %v1069_v40 = vpop.permute.xlu0 %1068 }
 0x15a   : > { %v2403_v39 = vpop.permute.xlu1 %1216 }
 0x15b   : > { %1491 = vrot.lane.b32.xlu1 %v2331_v19, %s1888_s7  ;;  %v2408_v61 = vpop.permute.xlu0 %1116 }
 0x15c   : > { %1842 = vset.pattern.permute.xlu1 %v2616_v29 }
 0x15e   : > { %v2410_v49 = vpop.permute.xlu1 %1232 }
 0x15f   : > { %1493 = vrot.lane.b32.xlu1 %v2333_v59, %s1888_s7  ;;  %v2416_v63 = vpop.permute.xlu0 %1142 }
 0x162   : > { %v2418_v16 = vpop.permute.xlu1 %1264 }
 0x163   : > { %1548 = vperm.xlu1 %1842, %v2047_v33   ;;  %v2420_v45 = vpop.permute.xlu0 %1190 }
 0x166   : > { %v2422_v41 = vpop.permute.xlu1 %1280 }
 0x167   : > { %1843 = vset.pattern.permute.xlu1 %v2617_v34 }
 0x168   : > { %1574 = vperm.xlu1 %1843, %v2047_v33  }
 0x16a   : > { %v2426_v47 = vpop.permute.xlu1 %1312 }
 0x16c   : > { %1563 = vrot.lane.b32.xlu1 %v2331_v19, %s1901_s10 }
 0x16d   : > { %1846 = vset.pattern.permute.xlu1 %v2618_v37 }
 0x16e   : > { %v2430_v13 = vpop.permute.xlu1 %1328 }
 0x170   : > { %1565 = vrot.lane.b32.xlu1 %v2333_v59, %s1901_s10 }
 0x174   : > { %1622 = vperm.xlu1 %1846, %v2047_v33   ;;  %v2424_v33 = vpop.permute.xlu0 %1248 }
 0x178   : > { %1847 = vset.pattern.permute.xlu1 %v1859_v1  ;;  %v2428_v9 = vpop.permute.xlu0 %1296 }
 0x179   : > { %1639 = vperm.xlu1 %1847, %v255_v0  }
 0x192   : > { %v987_v54 = vpop.permute.xlu1 %986  ;;  %v985_v8 = vpop.permute.xlu0 %984 }
 0x193   : > { %v988_v1 = vsel %vm264_vm0, %v985_v8, %v987_v54  ;;  %v991_v48 = vsel %vm264_vm0, 0.0, %v985_v8 }
 0x194   : > { %v992_v22 = vsel %vm2135_vm2, %v991_v48, 0.0  ;;  %v993_v20 = vsel %vm2111_vm1, %v988_v1, 0.0 }
 0x195   : > { %v1002_v11 = vrot.slane %v992_v22, %v2128_v62  ;;  %v1006_v52 = vrot.slane %v993_v20, %v2128_v62  ;;  %v1018_v56 = vrot.slane %v992_v22, %v2117_v57  ;;  %v1022_v18 = vrot.slane %v993_v20, %v2117_v57 }
 0x196   : > { %v1034_v2 = vrot.slane %v992_v22, %v2121_v60  ;;  %v1038_v51 = vrot.slane %v993_v20, %v2121_v60  ;;  %v1050_v14 = vrot.slane %v992_v22, %v2146_v12  ;;  %v1060_v15 = vpop.permute.xlu1 %1059  ;;  %v1054_v6 = vrot.slane %v993_v20, %v2146_v12  ;;  %v2451_v54 = vpop.permute.xlu0 %1205 }
 0x197   : > { %v1007_v44 = vmul.f32 %v1002_v11, %v997_v25  ;;  %v1008_v43 = vmul.f32 %v1006_v52, %v997_v25  ;;  %v1023_v53 = vmul.f32 %v1018_v56, %v1013_v30  ;;  %v1024_v5 = vmul.f32 %v1022_v18, %v1013_v30 }
 0x198   : > { %v1039_v21 = vmul.f32 %v1034_v2, %v1029_v23  ;;  %v1040_v58 = vmul.f32 %v1038_v51, %v1029_v23  ;;  %v1066_v24 = vsel %vm346_vm3, 0.0, %v1060_v15  ;;  %v1055_v4 = vmul.f32 %v1050_v14, %v1045_v35 }
 0x199   : > { %v1025_v42 = vadd.f32 %v1023_v53, %v1007_v44  ;;  %v1026_v17 = vadd.f32 %v1024_v5, %v1008_v43  ;;  %v1074_v38 = vrot.slane %v1066_v24, %v2128_v62  ;;  %v1090_v26 = vrot.slane %v1066_v24, %v2117_v57 }
 0x19a   : > { %v1062_v10 = vpop.permute.xlu1 %1061  ;;  %v1056_v25 = vmul.f32 %v1054_v6, %v1045_v35  ;;  %v1106_v37 = vrot.slane %v1066_v24, %v2121_v60  ;;  %v1122_v20 = vrot.slane %v1066_v24, %v2146_v12  ;;  %v1212_v18 = vsel %vm500_vm7, 0.0, %v2451_v54 }
 0x19b   : > { %v1041_v7 = vadd.f32 %v1039_v21, %v1025_v42  ;;  %v1042_v28 = vadd.f32 %v1040_v58, %v1026_v17  ;;  %v1063_v29 = vsel %vm346_vm3, %v1060_v15, %v1062_v10  ;;  %v1079_v34 = vmul.f32 %v1074_v38, %v1069_v40 }
 0x19c   : > { %v1078_v23 = vrot.slane %v1063_v29, %v2128_v62  ;;  %v1094_v8 = vrot.slane %v1063_v29, %v2117_v57  ;;  %v1095_v22 = vmul.f32 %v1090_v26, %v2384_v27  ;;  %v1110_v35 = vrot.slane %v1063_v29, %v2121_v60 }
 0x19d   : > { %v1057_v30 = vadd.f32 %v1055_v4, %v1041_v7  ;;  %v1058_v0 = vadd.f32 %v1056_v25, %v1042_v28  ;;  %v1111_v56 = vmul.f32 %v1106_v37, %v2389_v31  ;;  %v1126_v15 = vrot.slane %v1063_v29, %v2146_v12 }
 0x19e   : > { %v1132_v1 = vpop.permute.xlu1 %1131  ;;  %v1080_v11 = vmul.f32 %v1078_v23, %v1069_v40  ;;  %v1096_v14 = vmul.f32 %v1094_v8, %v2384_v27  ;;  %v1127_v53 = vmul.f32 %v1122_v20, %v2408_v61  ;;  %v1112_v42 = vmul.f32 %v1110_v35, %v2389_v31 }
 0x19f   : > { %v1081_v48 = vadd.f32 %v1079_v34, %v1057_v30  ;;  %v1138_v2 = vsel %vm419_vm4, 0.0, %v1132_v1  ;;  %v1213_v38 = vsel %vm2135_vm2, %v1212_v18, 0.0  ;;  %v1128_v7 = vmul.f32 %v1126_v15, %v2408_v61 }
 0x1a0   : > { %v1082_v51 = vadd.f32 %v1080_v11, %v1058_v0  ;;  %v1139_v44 = vsel %vm2191_vm6, %v1138_v2, 0.0  ;;  %v1222_v0 = vrot.slane %v1213_v38, %v2128_v62  ;;  %v1254_v2 = vrot.slane %v1213_v38, %v2121_v60 }
 0x1a1   : > { %v1097_v52 = vadd.f32 %v1095_v22, %v1081_v48  ;;  %v1148_v5 = vrot.slane %v1139_v44, %v2128_v62  ;;  %v1164_v21 = vrot.slane %v1139_v44, %v2117_v57  ;;  %v1180_v24 = vrot.slane %v1139_v44, %v2121_v60 }
 0x1a2   : > { %v1134_v43 = vpop.permute.xlu1 %1133  ;;  %v1098_v6 = vadd.f32 %v1096_v14, %v1082_v51  ;;  %v1196_v29 = vrot.slane %v1139_v44, %v2146_v12  ;;  %v1238_v48 = vrot.slane %v1213_v38, %v2117_v57  ;;  %v1270_v15 = vrot.slane %v1213_v38, %v2146_v12 }
 0x1a3   : > { %v1113_v40 = vadd.f32 %v1111_v56, %v1097_v52  ;;  %v1135_v17 = vsel %vm419_vm4, %v1132_v1, %v1134_v43  ;;  %v1153_v27 = vmul.f32 %v1148_v5, %v2416_v63  ;;  %v1169_v31 = vmul.f32 %v1164_v21, %v2394_v32 }
 0x1a4   : > { %v1140_v4 = vsel %vm2173_vm5, %v1135_v17, 0.0  ;;  %v1114_v10 = vadd.f32 %v1112_v42, %v1098_v6  ;;  %v1185_v8 = vmul.f32 %v1180_v24, %v2398_v36  ;;  %v1201_v20 = vmul.f32 %v1196_v29, %v2420_v45 }
 0x1a5   : > { %v1129_v58 = vadd.f32 %v1127_v53, %v1113_v40  ;;  %v1152_v28 = vrot.slane %v1140_v4, %v2128_v62  ;;  %v1168_v25 = vrot.slane %v1140_v4, %v2117_v57  ;;  %v1184_v37 = vrot.slane %v1140_v4, %v2121_v60 }
 0x1a6   : > { %v1130_v30 = vadd.f32 %v1128_v7, %v1114_v10  ;;  %v1243_v18 = vmul.f32 %v1238_v48, %v2410_v49  ;;  %v1200_v40 = vrot.slane %v1140_v4, %v2146_v12  ;;  %v1275_v53 = vmul.f32 %v1270_v15, %v2418_v16 }
 0x1a7   : > { %v1155_v26 = vadd.f32 %v1153_v27, %v1129_v58  ;;  %v1154_v34 = vmul.f32 %v1152_v28, %v2416_v63  ;;  %v1170_v1 = vmul.f32 %v1168_v25, %v2394_v32  ;;  %v1186_v35 = vmul.f32 %v1184_v37, %v2398_v36  ;;  %v1355_v36 = vpop.permute.xlu0 %1354 }
 0x1a8   : > { %v1227_v63 = vmul.f32 %v1222_v0, %v2403_v39  ;;  %v1259_v32 = vmul.f32 %v1254_v2, %v2424_v33  ;;  %v1286_v6 = vrot.slane %v2331_v19, %v2128_v62  ;;  %v1202_v58 = vmul.f32 %v1200_v40, %v2420_v45 }
 0x1a9   : > { %v1171_v23 = vadd.f32 %v1169_v31, %v1155_v26  ;;  %v1156_v61 = vadd.f32 %v1154_v34, %v1130_v30  ;;  %v1302_v4 = vrot.slane %v2331_v19, %v2117_v57  ;;  %v1338_v40 = vrot.slane %v2333_v59, %v2146_v12 }
 0x1aa   : > { %v1291_v38 = vmul.f32 %v1286_v6, %v2422_v41 }
 0x1ab   : > { %v1187_v22 = vadd.f32 %v1185_v8, %v1171_v23  ;;  %v1172_v11 = vadd.f32 %v1170_v1, %v1156_v61  ;;  %v1346_v7 = vpop.permute.xlu0 %1345  ;;  %v1307_v34 = vmul.f32 %v1302_v4, %v2428_v9  ;;  %v1318_v61 = vrot.slane %v2331_v19, %v2121_v60 }
 0x1ac   : > { %v1350_v48 = vsel %vm679_vm8, %v1346_v7, 0.0  ;;  %v1340_v6 = vmul.f32 %v1338_v40, %v2430_v13 }
 0x1ad   : > { %v1203_v52 = vadd.f32 %v1201_v20, %v1187_v22  ;;  %v1188_v56 = vadd.f32 %v1186_v35, %v1172_v11 }
 0x1af   : > { %v1229_v51 = vadd.f32 %v1227_v63, %v1203_v52  ;;  %v1403_v15 = vpop.permute.xlu0 %1402 }
 0x1b1   : > { %v1245_v14 = vadd.f32 %v1243_v18, %v1229_v51  ;;  %v1352_v18 = vsel %vm2173_vm5, %v1350_v48, 0.0 }
 0x1b3   : > { %v2495_v44 = vpop.permute.xlu1 %1370  ;;  %v1261_v43 = vadd.f32 %v1259_v32, %v1245_v14  ;;  %v1418_v4 = vpop.permute.xlu0 %1417 }
 0x1b5   : > { %v1277_v17 = vadd.f32 %v1275_v53, %v1261_v43 }
 0x1b7   : > { %v1208_v5 = vpop.permute.xlu1 %1207  ;;  %v1293_v29 = vadd.f32 %v1291_v38, %v1277_v17  ;;  %v1396_v38 = vrot.slane %v1352_v18, %v2121_v60 }
 0x1b8   : > { %v1209_v21 = vsel %vm500_vm7, %v2451_v54, %v1208_v5  ;;  %v1204_v54 = vadd.f32 %v1202_v58, %v1188_v56  ;;  %v1334_v56 = vrot.slane %v2331_v19, %v2146_v12  ;;  %v1364_v19 = vrot.slane %v1352_v18, %v2128_v62 }
 0x1b9   : > { %v1214_v42 = vsel %vm2111_vm1, %v1209_v21, 0.0  ;;  %v1309_v1 = vadd.f32 %v1307_v34, %v1293_v29 }
 0x1ba   : > { %v1226_v27 = vrot.slane %v1214_v42, %v2128_v62  ;;  %v1242_v24 = vrot.slane %v1214_v42, %v2117_v57  ;;  %v1258_v26 = vrot.slane %v1214_v42, %v2121_v60  ;;  %v1274_v30 = vrot.slane %v1214_v42, %v2146_v12 }
 0x1bb   : > { %v1344_v10 = vpop.permute.xlu1 %1343  ;;  %v1339_v32 = vmul.f32 %v1334_v56, %v2430_v13  ;;  %v1366_v58 = vmul.f32 %v1364_v19, %v1355_v36 }
 0x1bc   : > { %v1228_v28 = vmul.f32 %v1226_v27, %v2403_v39  ;;  %v1347_v31 = vsel %vm679_vm8, %v1344_v10, %v1346_v7  ;;  %v1244_v25 = vmul.f32 %v1242_v24, %v2410_v49  ;;  %v1260_v23 = vmul.f32 %v1258_v26, %v2424_v33 }
 0x1bd   : > { %v1351_v8 = vsel %vm2191_vm6, %v1347_v31, 0.0  ;;  %v1306_v39 = vrot.slane %v2333_v59, %v2117_v57  ;;  %v1290_v49 = vrot.slane %v2333_v59, %v2128_v62  ;;  %v1276_v20 = vmul.f32 %v1274_v30, %v2418_v16 }
 0x1be   : > { %v1230_v45 = vadd.f32 %v1228_v28, %v1204_v54  ;;  %v1323_v33 = vmul.f32 %v1318_v61, %v2426_v47  ;;  %v1360_v11 = vrot.slane %v1351_v8, %v2128_v62  ;;  %v1322_v16 = vrot.slane %v2333_v59, %v2121_v60 }
 0x1bf   : > { %v1387_v37 = vpop.permute.xlu1 %1386  ;;  %v1292_v35 = vmul.f32 %v1290_v49, %v2422_v41  ;;  %v1308_v51 = vmul.f32 %v1306_v39, %v2428_v9  ;;  %v1376_v5 = vrot.slane %v1351_v8, %v2117_v57  ;;  %v1380_v27 = vrot.slane %v1352_v18, %v2117_v57 }
 0x1c0   : > { %v1246_v0 = vadd.f32 %v1244_v25, %v1230_v45  ;;  %v1325_v2 = vadd.f32 %v1323_v33, %v1309_v1  ;;  %v1365_v43 = vmul.f32 %v1360_v11, %v1355_v36  ;;  %v1324_v41 = vmul.f32 %v1322_v16, %v2426_v47 }
 0x1c1   : > { %v1381_v47 = vmul.f32 %v1376_v5, %v2495_v44  ;;  %v1392_v59 = vrot.slane %v1351_v8, %v2121_v60  ;;  %v1382_v54 = vmul.f32 %v1380_v27, %v2495_v44  ;;  %v1412_v36 = vrot.slane %v1352_v18, %v2146_v12 }
 0x1c2   : > { %v1262_v22 = vadd.f32 %v1260_v23, %v1246_v0  ;;  %v1341_v21 = vadd.f32 %v1339_v32, %v1325_v2  ;;  %v1398_v45 = vmul.f32 %v1396_v38, %v1387_v37  ;;  %v1408_v30 = vrot.slane %v1351_v8, %v2146_v12 }
 0x1c3   : > { %v1397_v34 = vmul.f32 %v1392_v59, %v1387_v37  ;;  %v1414_v39 = vmul.f32 %v1412_v36, %v1403_v15 }
 0x1c4   : > { %v1278_v63 = vadd.f32 %v1276_v20, %v1262_v22  ;;  %v1429_v52 = vpop.permute.xlu1 %1428  ;;  %v1367_v17 = vadd.f32 %v1365_v43, %v1341_v21  ;;  %v1413_v49 = vmul.f32 %v1408_v30, %v1403_v15 }
 0x1c6   : > { %v1294_v14 = vadd.f32 %v1292_v35, %v1278_v63  ;;  %v1383_v26 = vadd.f32 %v1381_v47, %v1367_v17 }
 0x1c8   : > { %v1310_v53 = vadd.f32 %v1308_v51, %v1294_v14  ;;  %v1399_v61 = vadd.f32 %v1397_v34, %v1383_v26  ;;  %v1461_v51 = vpop.permute.xlu0 %1460 }
 0x1c9   : > { %v1445_v9 = vpop.permute.xlu1 %1444 }
 0x1ca   : > { %v1326_v42 = vadd.f32 %v1324_v41, %v1310_v53  ;;  %v1415_v20 = vadd.f32 %v1413_v49, %v1399_v61 }
 0x1cc   : > { %v1342_v24 = vadd.f32 %v1340_v6, %v1326_v42 }
 0x1cd   : > { %v1420_v10 = vpop.permute.xlu1 %1419 }
 0x1ce   : > { %v1368_v7 = vadd.f32 %v1366_v58, %v1342_v24  ;;  %v1421_v28 = vsel %vm754_vm9, %v1418_v4, %v1420_v10  ;;  %v1424_v13 = vsel %vm754_vm9, %v1420_v10, 0.0  ;;  %v1517_v24 = vpop.permute.xlu0 %1516 }
 0x1cf   : > { %v1425_v31 = vsel %vm2135_vm2, %v1421_v28, 0.0  ;;  %v1426_v25 = vsel %vm2111_vm1, %v1424_v13, 0.0 }
 0x1d0   : > { %v1384_v29 = vadd.f32 %v1382_v54, %v1368_v7  ;;  %v1434_v44 = vrot.slane %v1425_v31, %v2128_v62  ;;  %v1438_v1 = vrot.slane %v1426_v25, %v2128_v62  ;;  %v1450_v55 = vrot.slane %v1425_v31, %v2117_v57 }
 0x1d1   : > { %v1477_v0 = vpop.permute.xlu1 %1476  ;;  %v1454_v11 = vrot.slane %v1426_v25, %v2117_v57  ;;  %v1466_v18 = vrot.slane %v1425_v31, %v2121_v60  ;;  %v1470_v2 = vrot.slane %v1426_v25, %v2121_v60  ;;  %v1486_v32 = vrot.slane %v1426_v25, %v2146_v12 }
 0x1d2   : > { %v1400_v23 = vadd.f32 %v1398_v45, %v1384_v29  ;;  %v1439_v3 = vmul.f32 %v1434_v44, %v1429_v52  ;;  %v1440_v33 = vmul.f32 %v1438_v1, %v1429_v52  ;;  %v1455_v63 = vmul.f32 %v1450_v55, %v1445_v9 }
 0x1d3   : > { %v1456_v56 = vmul.f32 %v1454_v11, %v1445_v9  ;;  %v1482_v52 = vrot.slane %v1425_v31, %v2146_v12  ;;  %v1471_v43 = vmul.f32 %v1466_v18, %v1461_v51  ;;  %v1472_v41 = vmul.f32 %v1470_v2, %v1461_v51  ;;  %v1533_v31 = vpop.permute.xlu0 %1532 }
 0x1d4   : > { %v1416_v48 = vadd.f32 %v1414_v39, %v1400_v23  ;;  %v1441_v8 = vadd.f32 %v1439_v3, %v1415_v20  ;;  %v1488_v17 = vmul.f32 %v1486_v32, %v1477_v0 }
 0x1d5   : > { %v1487_v42 = vmul.f32 %v1482_v52, %v1477_v0 }
 0x1d6   : > { %v1501_v22 = vpop.permute.xlu1 %1500  ;;  %v1442_v37 = vadd.f32 %v1440_v33, %v1416_v48  ;;  %v1457_v16 = vadd.f32 %v1455_v63, %v1441_v8 }
 0x1d7   : > { %v1591_v1 = vpop.permute.xlu0 %1590 }
 0x1d8   : > { %v1458_v14 = vadd.f32 %v1456_v56, %v1442_v37  ;;  %v1473_v21 = vadd.f32 %v1471_v43, %v1457_v16 }
 0x1da   : > { %v1492_v35 = vpop.permute.xlu1 %1491  ;;  %v1474_v9 = vadd.f32 %v1472_v41, %v1458_v14  ;;  %v1489_v4 = vadd.f32 %v1487_v42, %v1473_v21 }
 0x1db   : > { %v1607_v16 = vpop.permute.xlu0 %1606 }
 0x1dc   : > { %v1490_v47 = vadd.f32 %v1488_v17, %v1474_v9  ;;  %v1850_v9 = vld [vmem:[%s1957_s25] sm:$0xff] }
 0x1de   : > { %v1494_v15 = vpop.permute.xlu1 %1493 }
 0x1df   : > { %v1495_v40 = vsel %vm829_vm10, %v1492_v35, %v1494_v15  ;;  %v1498_v19 = vsel %vm829_vm10, %v1494_v15, 0.0 }
 0x1e0   : > { %v1506_v53 = vrot.slane %v1495_v40, %v2128_v62  ;;  %v1510_v5 = vrot.slane %v1498_v19, %v2128_v62  ;;  %v1522_v59 = vrot.slane %v1495_v40, %v2117_v57  ;;  %v1526_v38 = vrot.slane %v1498_v19, %v2117_v57 }
 0x1e1   : > { %v1538_v36 = vrot.slane %v1495_v40, %v2121_v60  ;;  %v1542_v26 = vrot.slane %v1498_v19, %v2121_v60  ;;  %v1554_v44 = vrot.slane %v1495_v40, %v2146_v12  ;;  %v1558_v0 = vrot.slane %v1498_v19, %v2146_v12 }
 0x1e2   : > { %v1549_v6 = vpop.permute.xlu1 %1548  ;;  %v1511_v58 = vmul.f32 %v1506_v53, %v1501_v22  ;;  %v1512_v27 = vmul.f32 %v1510_v5, %v1501_v22  ;;  %v1527_v28 = vmul.f32 %v1522_v59, %v1517_v24  ;;  %v1528_v13 = vmul.f32 %v1526_v38, %v1517_v24 }
 0x1e3   : > { %v1543_v30 = vmul.f32 %v1538_v36, %v1533_v31  ;;  %v1544_v34 = vmul.f32 %v1542_v26, %v1533_v31  ;;  %v1559_v3 = vmul.f32 %v1554_v44, %v1549_v6  ;;  %v1560_v22 = vmul.f32 %v1558_v0, %v1549_v6 }
 0x1e4   : > { %v1513_v10 = vadd.f32 %v1511_v58, %v1489_v4  ;;  %v1514_v54 = vadd.f32 %v1512_v27, %v1490_v47  ;;  %v1645_v6 = vcombine.high %v1850_v9, %v1850_v9 }
 0x1e6   : > { %v1529_v29 = vadd.f32 %v1527_v28, %v1513_v10  ;;  %v1530_v45 = vadd.f32 %v1528_v13, %v1514_v54 }
 0x1e7   : > { %v1575_v7 = vpop.permute.xlu1 %1574 }
 0x1e8   : > { %v1545_v23 = vadd.f32 %v1543_v30, %v1529_v29  ;;  %v1546_v39 = vadd.f32 %v1544_v34, %v1530_v45 }
 0x1ea   : > { %v1561_v35 = vadd.f32 %v1559_v3, %v1545_v23  ;;  %v1562_v63 = vadd.f32 %v1560_v22, %v1546_v39 }
 0x1eb   : > { %v1564_v25 = vpop.permute.xlu1 %1563 }
 0x1ef   : > { %v1566_v61 = vpop.permute.xlu1 %1565 }
 0x1f0   : > { %v1567_v49 = vsel %vm902_vm11, %v1564_v25, %v1566_v61  ;;  %v1570_v48 = vsel %vm902_vm11, %v1566_v61, 0.0 }
 0x1f1   : > { %v1571_v20 = vsel %vm2191_vm6, %v1567_v49, 0.0  ;;  %v1572_v33 = vsel %vm2173_vm5, %v1570_v48, 0.0 }
 0x1f2   : > { %v1580_v55 = vrot.slane %v1571_v20, %v2128_v62  ;;  %v1584_v11 = vrot.slane %v1572_v33, %v2128_v62  ;;  %v1596_v8 = vrot.slane %v1571_v20, %v2117_v57  ;;  %v1600_v37 = vrot.slane %v1572_v33, %v2117_v57 }
 0x1f3   : > { %v1612_v2 = vrot.slane %v1571_v20, %v2121_v60  ;;  %v1616_v50 = vrot.slane %v1572_v33, %v2121_v60  ;;  %v1628_v51 = vrot.slane %v1571_v20, %v2146_v12  ;;  %v1632_v46 = vrot.slane %v1572_v33, %v2146_v12  ;;  %v1623_v15 = vpop.permute.xlu1 %1622 }
 0x1f4   : > { %v1585_v56 = vmul.f32 %v1580_v55, %v1575_v7  ;;  %v1586_v18 = vmul.f32 %v1584_v11, %v1575_v7  ;;  %v1601_v32 = vmul.f32 %v1596_v8, %v1591_v1  ;;  %v1602_v52 = vmul.f32 %v1600_v37, %v1591_v1 }
 0x1f5   : > { %v1617_v41 = vmul.f32 %v1612_v2, %v1607_v16  ;;  %v1618_v40 = vmul.f32 %v1616_v50, %v1607_v16  ;;  %v1633_v19 = vmul.f32 %v1628_v51, %v1623_v15  ;;  %v1634_v53 = vmul.f32 %v1632_v46, %v1623_v15 }
 0x1f6   : > { %v1587_v14 = vadd.f32 %v1585_v56, %v1561_v35  ;;  %v1588_v62 = vadd.f32 %v1586_v18, %v1562_v63 }
 0x1f8   : > { %v1603_v57 = vadd.f32 %v1601_v32, %v1587_v14  ;;  %v1604_v43 = vadd.f32 %v1602_v52, %v1588_v62  ;;  %v1640_v21 = vpop.permute.xlu1 %1639 }
 0x1fa   : > { %v1619_v5 = vadd.f32 %v1617_v41, %v1603_v57  ;;  %v1620_v60 = vadd.f32 %v1618_v40, %v1604_v43 }
 0x1fc   : > { %v1635_v12 = vadd.f32 %v1633_v19, %v1619_v5  ;;  %v1636_v42 = vadd.f32 %v1634_v53, %v1620_v60 }
 0x1fe   : > { %v1642_v17 = vadd.f32 %v1640_v21, %v1635_v12  ;;  %v1643_v58 = vadd.f32 %v1640_v21, %v1636_v42 }
 0x200   : > { %v1647_v27 = vadd.f32 %v1850_v9, %v1642_v17  ;;  %v1648_v24 = vadd.f32 %v1645_v6, %v1643_v58 }
 0x202   : > { %v1651_v4 = vcombine.low %v1647_v27, %v1648_v24 }
 0x204   : > { %1653 = vst [vmem:[%s224_s17] sm:$0xff] %v1651_v4 }
 0x205 PF: > { %s15_s18 = sadd.s32 1, %s1857_s18  }
 0x206   : > { %p12_p4 = scmp.ge.s32.totalorder %s15_s18, 4  }
 0x208   :  { %14 = sbr.rel (!%p12_p4) target bundleno = 1 (0x1), region = 70 }

</bundles_post_ra>
